<compile_context>
chip_gen: v5e
topology: v5e:2x2
jax: 0.10.0
libtpu: 0.0.40
codegen_flags: <defaults>
</compile_context>

<pallas_src>
import functools

import jax
import jax.numpy as jnp
from jax.experimental import pallas as pl
from jax.experimental.pallas import tpu as pltpu  # noqa: F401  (TPU backend)


# ----------------------------------------------------------------------------
# Pallas kernels
# ----------------------------------------------------------------------------
def conv_pool_relu_kernel(p0_ref, p1_ref, p2_ref, p3_ref, w_ref, b_ref, o_ref,
                          *, weight_left):
    """Fused conv-as-GEMM + bias + 2x2 maxpool + ReLU.

    The four p*_refs hold the im2col patch matrices of the four 2x2 pooling
    corners; the pooled conv output is the elementwise max of the four GEMMs
    (bias is corner-invariant, so it is added after the max).
      weight_left=True : o = relu(max_i(W @ P_i) + b),  o:(Cout, N) lane-dense
      weight_left=False: o = relu(max_i(P_i @ W) + b),  o:(M, Cout)
    """
    w = w_ref[...]
    if weight_left:
        dot = lambda p_ref: jnp.dot(w, p_ref[...],
                                    preferred_element_type=jnp.float32)
    else:
        dot = lambda p_ref: jnp.dot(p_ref[...], w,
                                    preferred_element_type=jnp.float32)
    m = jnp.maximum(jnp.maximum(dot(p0_ref), dot(p1_ref)),
                    jnp.maximum(dot(p2_ref), dot(p3_ref)))
    o_ref[...] = jnp.maximum(m + b_ref[...], 0.0)


def fc_tail_kernel(x_ref, w1_ref, b1_ref, w2_ref, b2_ref, o_ref):
    """Fused fc1 + ReLU + fc2 + log_softmax; everything stays in VMEM."""
    h = jnp.dot(x_ref[...], w1_ref[...],
                preferred_element_type=jnp.float32) + b1_ref[...]
    h = jnp.maximum(h, 0.0)
    y = jnp.dot(h, w2_ref[...],
                preferred_element_type=jnp.float32) + b2_ref[...]
    s = y - jnp.max(y, axis=-1, keepdims=True)
    o_ref[...] = s - jnp.log(jnp.sum(jnp.exp(s), axis=-1, keepdims=True))


# ----------------------------------------------------------------------------
# Pallas wrappers (single whole-array block; all operands are tiny here)
# ----------------------------------------------------------------------------
def _full2d(shape):
    return pl.BlockSpec(shape, lambda i: (0, 0))


def pallas_conv_pool_relu(corners, w, b, out_shape, weight_left):
    return pl.pallas_call(
        functools.partial(conv_pool_relu_kernel, weight_left=weight_left),
        out_shape=jax.ShapeDtypeStruct(out_shape, jnp.float32),
        grid=(1,),
        in_specs=[_full2d(c.shape) for c in corners]
                 + [_full2d(w.shape), _full2d(b.shape)],
        out_specs=_full2d(out_shape),
    )(*corners, w, b)


def pallas_fc_tail(x, w1, b1, w2, b2):
    out_shape = (x.shape[0], w2.shape[1])
    return pl.pallas_call(
        fc_tail_kernel,
        out_shape=jax.ShapeDtypeStruct(out_shape, jnp.float32),
        grid=(1,),
        in_specs=[_full2d(x.shape), _full2d(w1.shape), _full2d(b1.shape),
                  _full2d(w2.shape), _full2d(b2.shape)],
        out_specs=_full2d(out_shape),
    )(x, w1, b1, w2, b2)


# ----------------------------------------------------------------------------
# XLA glue: pooled-corner im2col (pure data movement, fused by XLA)
# ----------------------------------------------------------------------------
def conv_pool_patches(x_cbhw, k, ohp, owp, k_major):
    """Patch matrices for a k x k VALID conv followed by a 2x2/2 max pool.

    x_cbhw: (C, B, H, W) channel-major activations.
    Returns 4 arrays (one per pooling corner), each
      (C*k*k, B*ohp*owp) if k_major else (B*ohp*owp, C*k*k),
    with the contraction axis ordered (c, kh, kw) so it matches
    w.reshape(Cout, C*k*k).
    """
    C, B, H, W = x_cbhw.shape
    oh, ow = 2 * ohp, 2 * owp                     # conv output size pre-pool
    assert oh == H - k + 1 and ow == W - k + 1
    taps = [x_cbhw[:, :, kh:kh + oh, kw:kw + ow]
            for kh in range(k) for kw in range(k)]
    t = jnp.stack(taps, 0).reshape(k, k, C, B, oh, ow)
    t = t.transpose(2, 0, 1, 3, 4, 5)             # (C, kh, kw, B, oh, ow)
    out = []
    for ci in (0, 1):
        for cj in (0, 1):
            p = t[..., ci::2, cj::2]              # (C, k, k, B, ohp, owp)
            if k_major:
                out.append(p.reshape(C * k * k, B * ohp * owp))
            else:
                out.append(p.transpose(3, 4, 5, 0, 1, 2)
                            .reshape(B * ohp * owp, C * k * k))
    return out


# ----------------------------------------------------------------------------
# Parameters & forward
# ----------------------------------------------------------------------------
def init_params(key, num_classes=10, num_channels=1):
    ks = jax.random.split(key, 8)

    def u(k, shape, fan_in):
        bound = 1.0 / jnp.sqrt(jnp.float32(fan_in))
        return jax.random.uniform(k, shape, jnp.float32, -bound, bound)

    return {
        "w1": u(ks[0], (10, num_channels, 5, 5), num_channels * 25),
        "b1": u(ks[1], (10,), num_channels * 25),
        "w2": u(ks[2], (20, 10, 5, 5), 10 * 25),
        "b2": u(ks[3], (20,), 10 * 25),
        "wf1": u(ks[4], (50, 20 * 5 * 5), 20 * 5 * 5),
        "bf1": u(ks[5], (50,), 20 * 5 * 5),
        "wf2": u(ks[6], (num_classes, 50), 50),
        "bf2": u(ks[7], (num_classes,), 50),
    }


def lenet_forward(params, x):
    """x: (B, C, 32, 32) NCHW float32 -> (B, num_classes) log-probs."""
    B, C, H, W = x.shape
    num_classes = params["wf2"].shape[0]

    # channel-major view used by the patch builders
    x_c = jnp.transpose(x, (1, 0, 2, 3))                    # (C, B, 32, 32)

    # conv1 (C->10, k=5) + maxpool2 + relu, fused in one kernel.
    # Output (10, B*14*14): channel rows, lane-dense spatial columns.
    w1 = params["w1"].reshape(10, C * 25)
    p1 = conv_pool_patches(x_c, 5, 14, 14, k_major=True)    # 4 x (C*25, B*196)
    o1 = pallas_conv_pool_relu(p1, w1, params["b1"].reshape(10, 1),
                               out_shape=(10, B * 14 * 14), weight_left=True)
    x1_c = o1.reshape(10, B, 14, 14)                        # free reshape

    # conv2 (10->20, k=5) + Dropout2d(identity, eval) + maxpool2 + relu.
    # Output (B*5*5, 20): flattening to (B, 500) is a free reshape.
    w2t = params["w2"].reshape(20, 250).T                   # (250, 20)
    p2 = conv_pool_patches(x1_c, 5, 5, 5, k_major=False)    # 4 x (B*25, 250)
    o2 = pallas_conv_pool_relu(p2, w2t, params["b2"].reshape(1, 20),
                               out_shape=(B * 25, 20), weight_left=False)

    # fused FC tail: flatten -> fc1 + relu -> fc2 + log_softmax.
    # o2 flattens in (h, w, c) order; permute fc1's columns once to match.
    x2f = o2.reshape(B, 500)
    w1p = params["wf1"].reshape(50, 20, 25).transpose(2, 1, 0).reshape(500, 50)
    return pallas_fc_tail(x2f, w1p, params["bf1"].reshape(1, 50),
                          params["wf2"].T,
                          params["bf2"].reshape(1, num_classes))


# Pure-JAX reference for correctness checking.
def reference_forward(params, x):
    dn = ("NCHW", "OIHW", "NCHW")
    hi = jax.lax.Precision.HIGHEST
    y1 = jax.lax.conv_general_dilated(x, params["w1"], (1, 1), "VALID",
                                      dimension_numbers=dn, precision=hi)
    y1 = y1 + params["b1"][None, :, None, None]
    x1 = jax.nn.relu(jax.lax.reduce_window(y1, -jnp.inf, jax.lax.max,
                                           (1, 1, 2, 2), (1, 1, 2, 2), "VALID"))
    y2 = jax.lax.conv_general_dilated(x1, params["w2"], (1, 1), "VALID",
                                      dimension_numbers=dn, precision=hi)
    y2 = y2 + params["b2"][None, :, None, None]
    x2 = jax.nn.relu(jax.lax.reduce_window(y2, -jnp.inf, jax.lax.max,
                                           (1, 1, 2, 2), (1, 1, 2, 2), "VALID"))
    x2 = x2.reshape(x.shape[0], -1)
    x3 = jax.nn.relu(jnp.dot(x2, params["wf1"].T, precision=hi) + params["bf1"])
    logits = jnp.dot(x3, params["wf2"].T, precision=hi) + params["bf2"]
    return jax.nn.log_softmax(logits, axis=1)


if __name__ == "__main__":
    num_classes = 10
    batch, channels, size = 2, 1, 32   # input_size=32 -> feat_size = 20*5*5

    key = jax.random.PRNGKey(0)
    pkey, xkey = jax.random.split(key)
    params = init_params(pkey, num_classes=num_classes, num_channels=channels)
    x = jax.random.normal(xkey, (batch, channels, size, size), jnp.float32)

    out = jax.jit(lenet_forward)(params, x)
    out = jax.block_until_ready(out)
    assert out.shape == (batch, num_classes), out.shape

    ref = reference_forward(params, x)
    assert jnp.allclose(out, ref, atol=1e-2, rtol=1e-2), \
        float(jnp.max(jnp.abs(out - ref)))

    print("KERNEL_OK")
</pallas_src>

<mosaic_0001>
module attributes {stable_mosaic.version = 11 : i64} {
  func.func @conv_pool_relu_kernel(%arg0: i32, %arg1: memref<25x392xf32, #tpu.memory_space<vmem>>, %arg2: memref<25x392xf32, #tpu.memory_space<vmem>>, %arg3: memref<25x392xf32, #tpu.memory_space<vmem>>, %arg4: memref<25x392xf32, #tpu.memory_space<vmem>>, %arg5: memref<10x25xf32, #tpu.memory_space<vmem>>, %arg6: memref<10x1xf32, #tpu.memory_space<vmem>>, %arg7: memref<10x392xf32, #tpu.memory_space<vmem>>) attributes {dimension_semantics = [#tpu.dimension_semantics<arbitrary>], iteration_bounds = array<i64: 1>, scalar_prefetch = 0 : i64, scratch_operands = 0 : i64, tpu.core_type = #tpu.core_type<tc>, window_params = [{pipeline_mode = #tpu.pipeline_mode<synchronous>, transform_indices = @transform_0, window_bounds = array<i64: 25, 392>}, {pipeline_mode = #tpu.pipeline_mode<synchronous>, transform_indices = @transform_1, window_bounds = array<i64: 25, 392>}, {pipeline_mode = #tpu.pipeline_mode<synchronous>, transform_indices = @transform_2, window_bounds = array<i64: 25, 392>}, {pipeline_mode = #tpu.pipeline_mode<synchronous>, transform_indices = @transform_3, window_bounds = array<i64: 25, 392>}, {pipeline_mode = #tpu.pipeline_mode<synchronous>, transform_indices = @transform_4, window_bounds = array<i64: 10, 25>}, {pipeline_mode = #tpu.pipeline_mode<synchronous>, transform_indices = @transform_5, window_bounds = array<i64: 10, 1>}, {pipeline_mode = #tpu.pipeline_mode<synchronous>, transform_indices = @transform_6, window_bounds = array<i64: 10, 392>}]} {
    %c0 = arith.constant 0 : index
    %c0_0 = arith.constant 0 : index
    %0 = vector.load %arg5[%c0, %c0_0] : memref<10x25xf32, #tpu.memory_space<vmem>>, vector<10x25xf32>
    %c0_1 = arith.constant 0 : index
    %c0_2 = arith.constant 0 : index
    %1 = vector.load %arg1[%c0_1, %c0_2] : memref<25x392xf32, #tpu.memory_space<vmem>>, vector<25x392xf32>
    %cst = arith.constant dense<0.000000e+00> : vector<10x392xf32>
    %2 = tpu.matmul %0, %1, %cst {dimension_numbers = #tpu.dot_dimension_numbers<[1], [0], [0], [1], [0, 0, 1, 1], [], []>} : vector<10x25xf32>, vector<25x392xf32>, vector<10x392xf32> -> vector<10x392xf32>
    %c0_3 = arith.constant 0 : index
    %c0_4 = arith.constant 0 : index
    %3 = vector.load %arg2[%c0_3, %c0_4] : memref<25x392xf32, #tpu.memory_space<vmem>>, vector<25x392xf32>
    %cst_5 = arith.constant dense<0.000000e+00> : vector<10x392xf32>
    %4 = tpu.matmul %0, %3, %cst_5 {dimension_numbers = #tpu.dot_dimension_numbers<[1], [0], [0], [1], [0, 0, 1, 1], [], []>} : vector<10x25xf32>, vector<25x392xf32>, vector<10x392xf32> -> vector<10x392xf32>
    %5 = arith.maximumf %2, %4 : vector<10x392xf32>
    %c0_6 = arith.constant 0 : index
    %c0_7 = arith.constant 0 : index
    %6 = vector.load %arg3[%c0_6, %c0_7] : memref<25x392xf32, #tpu.memory_space<vmem>>, vector<25x392xf32>
    %cst_8 = arith.constant dense<0.000000e+00> : vector<10x392xf32>
    %7 = tpu.matmul %0, %6, %cst_8 {dimension_numbers = #tpu.dot_dimension_numbers<[1], [0], [0], [1], [0, 0, 1, 1], [], []>} : vector<10x25xf32>, vector<25x392xf32>, vector<10x392xf32> -> vector<10x392xf32>
    %c0_9 = arith.constant 0 : index
    %c0_10 = arith.constant 0 : index
    %8 = vector.load %arg4[%c0_9, %c0_10] : memref<25x392xf32, #tpu.memory_space<vmem>>, vector<25x392xf32>
    %cst_11 = arith.constant dense<0.000000e+00> : vector<10x392xf32>
    %9 = tpu.matmul %0, %8, %cst_11 {dimension_numbers = #tpu.dot_dimension_numbers<[1], [0], [0], [1], [0, 0, 1, 1], [], []>} : vector<10x25xf32>, vector<25x392xf32>, vector<10x392xf32> -> vector<10x392xf32>
    %10 = arith.maximumf %7, %9 : vector<10x392xf32>
    %11 = arith.maximumf %5, %10 : vector<10x392xf32>
    %c0_12 = arith.constant 0 : index
    %c0_13 = arith.constant 0 : index
    %12 = vector.load %arg6[%c0_12, %c0_13] : memref<10x1xf32, #tpu.memory_space<vmem>>, vector<10x1xf32>
    %13 = vector.broadcast %12 : vector<10x1xf32> to vector<10x392xf32>
    %14 = arith.addf %11, %13 : vector<10x392xf32>
    %cst_14 = arith.constant 0.000000e+00 : f32
    %15 = vector.broadcast %cst_14 : f32 to vector<10x392xf32>
    %16 = arith.maximumf %14, %15 : vector<10x392xf32>
    %c0_15 = arith.constant 0 : index
    %c0_16 = arith.constant 0 : index
    %17 = vector.load %arg7[%c0_15, %c0_16] : memref<10x392xf32, #tpu.memory_space<vmem>>, vector<10x392xf32>
    tpu.vector_store %arg7[%c0_15, %c0_16], %16 {strides = array<i32>} : memref<10x392xf32, #tpu.memory_space<vmem>>, vector<10x392xf32>,
    return
  }
  func.func @transform_0(%arg0: i32) -> (i32, i32) {
    %c0_i32 = arith.constant 0 : i32
    %c0_i32_0 = arith.constant 0 : i32
    %c0_i32_1 = arith.constant 0 : i32
    return %c0_i32, %c0_i32_0 : i32, i32
  }
  func.func @transform_1(%arg0: i32) -> (i32, i32) {
    %c0_i32 = arith.constant 0 : i32
    %c0_i32_0 = arith.constant 0 : i32
    %c0_i32_1 = arith.constant 0 : i32
    return %c0_i32, %c0_i32_0 : i32, i32
  }
  func.func @transform_2(%arg0: i32) -> (i32, i32) {
    %c0_i32 = arith.constant 0 : i32
    %c0_i32_0 = arith.constant 0 : i32
    %c0_i32_1 = arith.constant 0 : i32
    return %c0_i32, %c0_i32_0 : i32, i32
  }
  func.func @transform_3(%arg0: i32) -> (i32, i32) {
    %c0_i32 = arith.constant 0 : i32
    %c0_i32_0 = arith.constant 0 : i32
    %c0_i32_1 = arith.constant 0 : i32
    return %c0_i32, %c0_i32_0 : i32, i32
  }
  func.func @transform_4(%arg0: i32) -> (i32, i32) {
    %c0_i32 = arith.constant 0 : i32
    %c0_i32_0 = arith.constant 0 : i32
    %c0_i32_1 = arith.constant 0 : i32
    return %c0_i32, %c0_i32_0 : i32, i32
  }
  func.func @transform_5(%arg0: i32) -> (i32, i32) {
    %c0_i32 = arith.constant 0 : i32
    %c0_i32_0 = arith.constant 0 : i32
    %c0_i32_1 = arith.constant 0 : i32
    return %c0_i32, %c0_i32_0 : i32, i32
  }
  func.func @transform_6(%arg0: i32) -> (i32, i32) {
    %c0_i32 = arith.constant 0 : i32
    %c0_i32_0 = arith.constant 0 : i32
    %c0_i32_1 = arith.constant 0 : i32
    return %c0_i32, %c0_i32_0 : i32, i32
  }
}

module attributes {stable_mosaic.version = 11 : i64} {
  func.func @conv_pool_relu_kernel(%arg0: i32, %arg1: memref<50x250xf32, #tpu.memory_space<vmem>>, %arg2: memref<50x250xf32, #tpu.memory_space<vmem>>, %arg3: memref<50x250xf32, #tpu.memory_space<vmem>>, %arg4: memref<50x250xf32, #tpu.memory_space<vmem>>, %arg5: memref<250x20xf32, #tpu.memory_space<vmem>>, %arg6: memref<1x20xf32, #tpu.memory_space<vmem>>, %arg7: memref<50x20xf32, #tpu.memory_space<vmem>>) attributes {dimension_semantics = [#tpu.dimension_semantics<arbitrary>], iteration_bounds = array<i64: 1>, scalar_prefetch = 0 : i64, scratch_operands = 0 : i64, tpu.core_type = #tpu.core_type<tc>, window_params = [{pipeline_mode = #tpu.pipeline_mode<synchronous>, transform_indices = @transform_0, window_bounds = array<i64: 50, 250>}, {pipeline_mode = #tpu.pipeline_mode<synchronous>, transform_indices = @transform_1, window_bounds = array<i64: 50, 250>}, {pipeline_mode = #tpu.pipeline_mode<synchronous>, transform_indices = @transform_2, window_bounds = array<i64: 50, 250>}, {pipeline_mode = #tpu.pipeline_mode<synchronous>, transform_indices = @transform_3, window_bounds = array<i64: 50, 250>}, {pipeline_mode = #tpu.pipeline_mode<synchronous>, transform_indices = @transform_4, window_bounds = array<i64: 250, 20>}, {pipeline_mode = #tpu.pipeline_mode<synchronous>, transform_indices = @transform_5, window_bounds = array<i64: 1, 20>}, {pipeline_mode = #tpu.pipeline_mode<synchronous>, transform_indices = @transform_6, window_bounds = array<i64: 50, 20>}]} {
    %c0 = arith.constant 0 : index
    %c0_0 = arith.constant 0 : index
    %0 = vector.load %arg5[%c0, %c0_0] : memref<250x20xf32, #tpu.memory_space<vmem>>, vector<250x20xf32>
    %c0_1 = arith.constant 0 : index
    %c0_2 = arith.constant 0 : index
    %1 = vector.load %arg1[%c0_1, %c0_2] : memref<50x250xf32, #tpu.memory_space<vmem>>, vector<50x250xf32>
    %cst = arith.constant dense<0.000000e+00> : vector<50x20xf32>
    %2 = tpu.matmul %1, %0, %cst {dimension_numbers = #tpu.dot_dimension_numbers<[1], [0], [0], [1], [0, 0, 1, 1], [], []>} : vector<50x250xf32>, vector<250x20xf32>, vector<50x20xf32> -> vector<50x20xf32>
    %c0_3 = arith.constant 0 : index
    %c0_4 = arith.constant 0 : index
    %3 = vector.load %arg2[%c0_3, %c0_4] : memref<50x250xf32, #tpu.memory_space<vmem>>, vector<50x250xf32>
    %cst_5 = arith.constant dense<0.000000e+00> : vector<50x20xf32>
    %4 = tpu.matmul %3, %0, %cst_5 {dimension_numbers = #tpu.dot_dimension_numbers<[1], [0], [0], [1], [0, 0, 1, 1], [], []>} : vector<50x250xf32>, vector<250x20xf32>, vector<50x20xf32> -> vector<50x20xf32>
    %5 = arith.maximumf %2, %4 : vector<50x20xf32>
    %c0_6 = arith.constant 0 : index
    %c0_7 = arith.constant 0 : index
    %6 = vector.load %arg3[%c0_6, %c0_7] : memref<50x250xf32, #tpu.memory_space<vmem>>, vector<50x250xf32>
    %cst_8 = arith.constant dense<0.000000e+00> : vector<50x20xf32>
    %7 = tpu.matmul %6, %0, %cst_8 {dimension_numbers = #tpu.dot_dimension_numbers<[1], [0], [0], [1], [0, 0, 1, 1], [], []>} : vector<50x250xf32>, vector<250x20xf32>, vector<50x20xf32> -> vector<50x20xf32>
    %c0_9 = arith.constant 0 : index
    %c0_10 = arith.constant 0 : index
    %8 = vector.load %arg4[%c0_9, %c0_10] : memref<50x250xf32, #tpu.memory_space<vmem>>, vector<50x250xf32>
    %cst_11 = arith.constant dense<0.000000e+00> : vector<50x20xf32>
    %9 = tpu.matmul %8, %0, %cst_11 {dimension_numbers = #tpu.dot_dimension_numbers<[1], [0], [0], [1], [0, 0, 1, 1], [], []>} : vector<50x250xf32>, vector<250x20xf32>, vector<50x20xf32> -> vector<50x20xf32>
    %10 = arith.maximumf %7, %9 : vector<50x20xf32>
    %11 = arith.maximumf %5, %10 : vector<50x20xf32>
    %c0_12 = arith.constant 0 : index
    %c0_13 = arith.constant 0 : index
    %12 = vector.load %arg6[%c0_12, %c0_13] : memref<1x20xf32, #tpu.memory_space<vmem>>, vector<1x20xf32>
    %13 = vector.broadcast %12 : vector<1x20xf32> to vector<50x20xf32>
    %14 = arith.addf %11, %13 : vector<50x20xf32>
    %cst_14 = arith.constant 0.000000e+00 : f32
    %15 = vector.broadcast %cst_14 : f32 to vector<50x20xf32>
    %16 = arith.maximumf %14, %15 : vector<50x20xf32>
    %c0_15 = arith.constant 0 : index
    %c0_16 = arith.constant 0 : index
    %17 = vector.load %arg7[%c0_15, %c0_16] : memref<50x20xf32, #tpu.memory_space<vmem>>, vector<50x20xf32>
    tpu.vector_store %arg7[%c0_15, %c0_16], %16 {strides = array<i32>} : memref<50x20xf32, #tpu.memory_space<vmem>>, vector<50x20xf32>,
    return
  }
  func.func @transform_0(%arg0: i32) -> (i32, i32) {
    %c0_i32 = arith.constant 0 : i32
    %c0_i32_0 = arith.constant 0 : i32
    %c0_i32_1 = arith.constant 0 : i32
    return %c0_i32, %c0_i32_0 : i32, i32
  }
  func.func @transform_1(%arg0: i32) -> (i32, i32) {
    %c0_i32 = arith.constant 0 : i32
    %c0_i32_0 = arith.constant 0 : i32
    %c0_i32_1 = arith.constant 0 : i32
    return %c0_i32, %c0_i32_0 : i32, i32
  }
  func.func @transform_2(%arg0: i32) -> (i32, i32) {
    %c0_i32 = arith.constant 0 : i32
    %c0_i32_0 = arith.constant 0 : i32
    %c0_i32_1 = arith.constant 0 : i32
    return %c0_i32, %c0_i32_0 : i32, i32
  }
  func.func @transform_3(%arg0: i32) -> (i32, i32) {
    %c0_i32 = arith.constant 0 : i32
    %c0_i32_0 = arith.constant 0 : i32
    %c0_i32_1 = arith.constant 0 : i32
    return %c0_i32, %c0_i32_0 : i32, i32
  }
  func.func @transform_4(%arg0: i32) -> (i32, i32) {
    %c0_i32 = arith.constant 0 : i32
    %c0_i32_0 = arith.constant 0 : i32
    %c0_i32_1 = arith.constant 0 : i32
    return %c0_i32, %c0_i32_0 : i32, i32
  }
  func.func @transform_5(%arg0: i32) -> (i32, i32) {
    %c0_i32 = arith.constant 0 : i32
    %c0_i32_0 = arith.constant 0 : i32
    %c0_i32_1 = arith.constant 0 : i32
    return %c0_i32, %c0_i32_0 : i32, i32
  }
  func.func @transform_6(%arg0: i32) -> (i32, i32) {
    %c0_i32 = arith.constant 0 : i32
    %c0_i32_0 = arith.constant 0 : i32
    %c0_i32_1 = arith.constant 0 : i32
    return %c0_i32, %c0_i32_0 : i32, i32
  }
}

module attributes {stable_mosaic.version = 11 : i64} {
  func.func @fc_tail_kernel(%arg0: i32, %arg1: memref<2x500xf32, #tpu.memory_space<vmem>>, %arg2: memref<500x50xf32, #tpu.memory_space<vmem>>, %arg3: memref<1x50xf32, #tpu.memory_space<vmem>>, %arg4: memref<50x10xf32, #tpu.memory_space<vmem>>, %arg5: memref<1x10xf32, #tpu.memory_space<vmem>>, %arg6: memref<2x10xf32, #tpu.memory_space<vmem>>) attributes {dimension_semantics = [#tpu.dimension_semantics<arbitrary>], iteration_bounds = array<i64: 1>, scalar_prefetch = 0 : i64, scratch_operands = 0 : i64, tpu.core_type = #tpu.core_type<tc>, window_params = [{pipeline_mode = #tpu.pipeline_mode<synchronous>, transform_indices = @transform_0, window_bounds = array<i64: 2, 500>}, {pipeline_mode = #tpu.pipeline_mode<synchronous>, transform_indices = @transform_1, window_bounds = array<i64: 500, 50>}, {pipeline_mode = #tpu.pipeline_mode<synchronous>, transform_indices = @transform_2, window_bounds = array<i64: 1, 50>}, {pipeline_mode = #tpu.pipeline_mode<synchronous>, transform_indices = @transform_3, window_bounds = array<i64: 50, 10>}, {pipeline_mode = #tpu.pipeline_mode<synchronous>, transform_indices = @transform_4, window_bounds = array<i64: 1, 10>}, {pipeline_mode = #tpu.pipeline_mode<synchronous>, transform_indices = @transform_5, window_bounds = array<i64: 2, 10>}]} {
    %c0 = arith.constant 0 : index
    %c0_0 = arith.constant 0 : index
    %0 = vector.load %arg1[%c0, %c0_0] : memref<2x500xf32, #tpu.memory_space<vmem>>, vector<2x500xf32>
    %c0_1 = arith.constant 0 : index
    %c0_2 = arith.constant 0 : index
    %1 = vector.load %arg2[%c0_1, %c0_2] : memref<500x50xf32, #tpu.memory_space<vmem>>, vector<500x50xf32>
    %cst = arith.constant dense<0.000000e+00> : vector<2x50xf32>
    %2 = tpu.matmul %0, %1, %cst {dimension_numbers = #tpu.dot_dimension_numbers<[1], [0], [0], [1], [0, 0, 1, 1], [], []>} : vector<2x500xf32>, vector<500x50xf32>, vector<2x50xf32> -> vector<2x50xf32>
    %c0_3 = arith.constant 0 : index
    %c0_4 = arith.constant 0 : index
    %3 = vector.load %arg3[%c0_3, %c0_4] : memref<1x50xf32, #tpu.memory_space<vmem>>, vector<1x50xf32>
    %4 = vector.broadcast %3 : vector<1x50xf32> to vector<2x50xf32>
    %5 = arith.addf %2, %4 : vector<2x50xf32>
    %cst_5 = arith.constant 0.000000e+00 : f32
    %6 = vector.broadcast %cst_5 : f32 to vector<2x50xf32>
    %7 = arith.maximumf %5, %6 : vector<2x50xf32>
    %c0_6 = arith.constant 0 : index
    %c0_7 = arith.constant 0 : index
    %8 = vector.load %arg4[%c0_6, %c0_7] : memref<50x10xf32, #tpu.memory_space<vmem>>, vector<50x10xf32>
    %cst_8 = arith.constant dense<0.000000e+00> : vector<2x10xf32>
    %9 = tpu.matmul %7, %8, %cst_8 {dimension_numbers = #tpu.dot_dimension_numbers<[1], [0], [0], [1], [0, 0, 1, 1], [], []>} : vector<2x50xf32>, vector<50x10xf32>, vector<2x10xf32> -> vector<2x10xf32>
    %c0_9 = arith.constant 0 : index
    %c0_10 = arith.constant 0 : index
    %10 = vector.load %arg5[%c0_9, %c0_10] : memref<1x10xf32, #tpu.memory_space<vmem>>, vector<1x10xf32>
    %11 = vector.broadcast %10 : vector<1x10xf32> to vector<2x10xf32>
    %12 = arith.addf %9, %11 : vector<2x10xf32>
    %cst_11 = arith.constant dense<0xFF800000> : vector<2xf32>
    %13 = vector.multi_reduction <maximumf>, %12, %cst_11 [1] : vector<2x10xf32> to vector<2xf32>
    %14 = vector.shape_cast %13 : vector<2xf32> to vector<2x1xf32>
    %15 = vector.broadcast %14 : vector<2x1xf32> to vector<2x10xf32>
    %16 = arith.subf %12, %15 : vector<2x10xf32>
    %17 = math.exp %16 : vector<2x10xf32>
    %cst_12 = arith.constant dense<0.000000e+00> : vector<2xf32>
    %18 = vector.multi_reduction <add>, %17, %cst_12 [1] : vector<2x10xf32> to vector<2xf32>
    %19 = vector.shape_cast %18 : vector<2xf32> to vector<2x1xf32>
    %20 = math.log %19 : vector<2x1xf32>
    %21 = vector.broadcast %20 : vector<2x1xf32> to vector<2x10xf32>
    %22 = arith.subf %16, %21 : vector<2x10xf32>
    %c0_13 = arith.constant 0 : index
    %c0_14 = arith.constant 0 : index
    %23 = vector.load %arg6[%c0_13, %c0_14] : memref<2x10xf32, #tpu.memory_space<vmem>>, vector<2x10xf32>
    tpu.vector_store %arg6[%c0_13, %c0_14], %22 {strides = array<i32>} : memref<2x10xf32, #tpu.memory_space<vmem>>, vector<2x10xf32>,
    return
  }
  func.func @transform_0(%arg0: i32) -> (i32, i32) {
    %c0_i32 = arith.constant 0 : i32
    %c0_i32_0 = arith.constant 0 : i32
    %c0_i32_1 = arith.constant 0 : i32
    return %c0_i32, %c0_i32_0 : i32, i32
  }
  func.func @transform_1(%arg0: i32) -> (i32, i32) {
    %c0_i32 = arith.constant 0 : i32
    %c0_i32_0 = arith.constant 0 : i32
    %c0_i32_1 = arith.constant 0 : i32
    return %c0_i32, %c0_i32_0 : i32, i32
  }
  func.func @transform_2(%arg0: i32) -> (i32, i32) {
    %c0_i32 = arith.constant 0 : i32
    %c0_i32_0 = arith.constant 0 : i32
    %c0_i32_1 = arith.constant 0 : i32
    return %c0_i32, %c0_i32_0 : i32, i32
  }
  func.func @transform_3(%arg0: i32) -> (i32, i32) {
    %c0_i32 = arith.constant 0 : i32
    %c0_i32_0 = arith.constant 0 : i32
    %c0_i32_1 = arith.constant 0 : i32
    return %c0_i32, %c0_i32_0 : i32, i32
  }
  func.func @transform_4(%arg0: i32) -> (i32, i32) {
    %c0_i32 = arith.constant 0 : i32
    %c0_i32_0 = arith.constant 0 : i32
    %c0_i32_1 = arith.constant 0 : i32
    return %c0_i32, %c0_i32_0 : i32, i32
  }
  func.func @transform_5(%arg0: i32) -> (i32, i32) {
    %c0_i32 = arith.constant 0 : i32
    %c0_i32_0 = arith.constant 0 : i32
    %c0_i32_1 = arith.constant 0 : i32
    return %c0_i32, %c0_i32_0 : i32, i32
  }
}

</mosaic_0001>

<bundles_post_ra>
// kernel: lenet_forward.3
= control target key start
LH: loop header
LB: loop body
LE: loop exit
PB: predicated region body
PF: predicated region fallthrough
CT: control target
= control target key end

     0   :  { %vm48_vm0 = vcmask 1040384   ;;  %vm41_vm1 = vcmask 203776   ;;  %vm568_vm2 = vcmask 64512   ;;  %vm573_vm3 = vcmask 58368   ;;  %s983_s0 = inlined_call_operand.vmem [shape: f32[25,392], index: 0, kind: input, shape index: {}]   ;;  %s984_s4 = inlined_call_operand.vmem [shape: f32[10,25], index: 4, kind: input, shape index: {}]   ;;  %s985_s1 = inlined_call_operand.vmem [shape: f32[25,392], index: 1, kind: input, shape index: {}]   ;;  %s986_s2 = inlined_call_operand.vmem [shape: f32[25,392], index: 2, kind: input, shape index: {}]   ;;  %s987_s3 = inlined_call_operand.vmem [shape: f32[25,392], index: 3, kind: input, shape index: {}]   ;;  %s988_s5 = inlined_call_operand.vmem [shape: f32[10,1], index: 5, kind: input, shape index: {}]   ;;  %s989_s6 = inlined_call_operand.vmem [shape: f32[10,392], index: 6, kind: output, shape index: {}]  }
   0x1   :  { %v37_v0 = vld [vmem:[%s983_s0 + $0x60] sm:$0x1]  ;;  %v38_v1 = vld [vmem:[%s983_s0 + $0x68] sm:$0x1]  ;;  %v39_v2 = vld [vmem:[%s983_s0 + $0x70] sm:$0x1] }
   0x2   :  { %579 = vmatpush.msk.msra.mxu0 %vm48_vm0, %v37_v0  ;;  %582 = vmatpush.msk.msra.mxu1 %vm48_vm0, %v38_v1  ;;  %v40_v3 = vld [vmem:[%s983_s0 + $0x78] sm:$0x1]  ;;  %v33_v4 = vld [vmem:[%s983_s0 + $0x40] sm:$0xff]  ;;  %v34_v5 = vld [vmem:[%s983_s0 + $0x48] sm:$0xff] }
   0x3   :  { %585 = vmatpush.msk.msra.mxu2 %vm48_vm0, %v39_v2  ;;  %588 = vmatpush.msk.msra.mxu3 %vm48_vm0, %v40_v3  ;;  %v35_v6 = vld [vmem:[%s983_s0 + $0x50] sm:$0xff]  ;;  %v36_v7 = vld [vmem:[%s983_s0 + $0x58] sm:$0xff]  ;;  %v29_v8 = vld [vmem:[%s983_s0 + $0x20] sm:$0xff]  ;;  %v629_v3 = vmov 0  }
   0x4   :  { %74 = vmatpush.msra.mxu0 %v33_v4  ;;  %97 = vmatpush.msra.mxu1 %v34_v5  ;;  %v30_v9 = vld [vmem:[%s983_s0 + $0x28] sm:$0xff]  ;;  %v31_v10 = vld [vmem:[%s983_s0 + $0x30] sm:$0xff]  ;;  %v32_v11 = vld [vmem:[%s983_s0 + $0x38] sm:$0xff] }
   0x5   :  { %120 = vmatpush.msra.mxu2 %v35_v6  ;;  %143 = vmatpush.msra.mxu3 %v36_v7  ;;  %v25_v12 = vld [vmem:[%s983_s0] sm:$0xff]  ;;  %v26_v13 = vld [vmem:[%s983_s0 + $0x8] sm:$0xff]  ;;  %v27_v14 = vld [vmem:[%s983_s0 + $0x10] sm:$0xff] }
   0x6   :  { %75 = vmatpush.msra.mxu0 %v29_v8  ;;  %98 = vmatpush.msra.mxu1 %v30_v9  ;;  %v28_v15 = vld [vmem:[%s983_s0 + $0x18] sm:$0xff]  ;;  %v720_v16 = vld [vmem:[%s984_s4] sm:$0xff]  ;;  %v167_v17 = vld [vmem:[%s985_s1 + $0x70] sm:$0x1] }
   0x7   :  { %121 = vmatpush.msra.mxu2 %v31_v10  ;;  %144 = vmatpush.msra.mxu3 %v32_v11  ;;  %v168_v18 = vld [vmem:[%s985_s1 + $0x78] sm:$0x1]  ;;  %v165_v19 = vld [vmem:[%s985_s1 + $0x60] sm:$0x1]  ;;  %v166_v20 = vld [vmem:[%s985_s1 + $0x68] sm:$0x1] }
   0x8   :  { %76 = vmatpush.msra.mxu0 %v25_v12  ;;  %99 = vmatpush.msra.mxu1 %v26_v13  ;;  %v163_v21 = vld [vmem:[%s985_s1 + $0x50] sm:$0xff]  ;;  %v164_v22 = vld [vmem:[%s985_s1 + $0x58] sm:$0xff]  ;;  %v161_v23 = vld [vmem:[%s985_s1 + $0x40] sm:$0xff] }
   0x9   :  { %122 = vmatpush.msra.mxu2 %v27_v14  ;;  %145 = vmatpush.msra.mxu3 %v28_v15  ;;  %v162_v24 = vld [vmem:[%s985_s1 + $0x48] sm:$0xff]  ;;  %v159_v25 = vld [vmem:[%s985_s1 + $0x30] sm:$0xff]  ;;  %v160_v26 = vld [vmem:[%s985_s1 + $0x38] sm:$0xff] }
   0xa   :  { %580 = vmatmul.msk.f32.vlgmr.msra.gmra.mxu0 %vm41_vm1, %v720_v16  ;;  %583 = vmatmul.msk.f32.vlgmr.msra.gmra.mxu1 %vm41_vm1, %v720_v16  ;;  %v157_v27 = vld [vmem:[%s985_s1 + $0x20] sm:$0xff]  ;;  %v158_v28 = vld [vmem:[%s985_s1 + $0x28] sm:$0xff]  ;;  %v155_v30 = vld [vmem:[%s985_s1 + $0x10] sm:$0xff] }
   0xb   :  { %586 = vmatmul.msk.f32.vlgmr.msra.gmra.mxu2 %vm41_vm1, %v720_v16  ;;  %589 = vmatmul.msk.f32.vlgmr.msra.gmra.mxu3 %vm41_vm1, %v720_v16  ;;  %v773_v29 = vld [vmem:[%s984_s4 + $0x8] sm:$0x3]  ;;  %v156_v31 = vld [vmem:[%s985_s1 + $0x18] sm:$0xff]  ;;  %v153_v32 = vld [vmem:[%s985_s1] sm:$0xff] }
   0xc   :  { %597 = vmatpush.msk.msrb.mxu2 %vm48_vm0, %v167_v17  ;;  %600 = vmatpush.msk.msrb.mxu3 %vm48_vm0, %v168_v18  ;;  %v154_v33 = vld [vmem:[%s985_s1 + $0x8] sm:$0xff]  ;;  %v295_v34 = vld [vmem:[%s986_s2 + $0x70] sm:$0x1]  ;;  %v296_v35 = vld [vmem:[%s986_s2 + $0x78] sm:$0x1] }
   0xd   :  { %591 = vmatpush.msk.msrb.mxu0 %vm48_vm0, %v165_v19  ;;  %594 = vmatpush.msk.msrb.mxu1 %vm48_vm0, %v166_v20  ;;  %v293_v36 = vld [vmem:[%s986_s2 + $0x60] sm:$0x1]  ;;  %v294_v37 = vld [vmem:[%s986_s2 + $0x68] sm:$0x1]  ;;  %v291_v38 = vld [vmem:[%s986_s2 + $0x50] sm:$0xff] }
   0xe   :  { %240 = vmatpush.msrb.mxu2 %v163_v21  ;;  %263 = vmatpush.msrb.mxu3 %v164_v22  ;;  %v292_v39 = vld [vmem:[%s986_s2 + $0x58] sm:$0xff]  ;;  %v289_v40 = vld [vmem:[%s986_s2 + $0x40] sm:$0xff]  ;;  %v290_v41 = vld [vmem:[%s986_s2 + $0x48] sm:$0xff] }
   0xf   :  { %194 = vmatpush.msrb.mxu0 %v161_v23  ;;  %217 = vmatpush.msrb.mxu1 %v162_v24  ;;  %v287_v42 = vld [vmem:[%s986_s2 + $0x30] sm:$0xff]  ;;  %v288_v43 = vld [vmem:[%s986_s2 + $0x38] sm:$0xff]  ;;  %v285_v44 = vld [vmem:[%s986_s2 + $0x20] sm:$0xff] }
  0x10   :  { %241 = vmatpush.msrb.mxu2 %v159_v25  ;;  %264 = vmatpush.msrb.mxu3 %v160_v26  ;;  %v286_v45 = vld [vmem:[%s986_s2 + $0x28] sm:$0xff]  ;;  %v283_v46 = vld [vmem:[%s986_s2 + $0x10] sm:$0xff]  ;;  %v284_v47 = vld [vmem:[%s986_s2 + $0x18] sm:$0xff] }
  0x11   :  { %195 = vmatpush.msrb.mxu0 %v157_v27  ;;  %218 = vmatpush.msrb.mxu1 %v158_v28  ;;  %v281_v48 = vld [vmem:[%s986_s2] sm:$0xff]  ;;  %v282_v49 = vld [vmem:[%s986_s2 + $0x8] sm:$0xff]  ;;  %v415_v50 = vld [vmem:[%s987_s3 + $0x70] sm:$0x1] }
  0x12   :  { %581 = vmatmul.msk.f32.gmra.mxu0 %vm41_vm1, %v773_v29  ;;  %584 = vmatmul.msk.f32.gmra.mxu1 %vm41_vm1, %v773_v29  ;;  %v416_v51 = vld [vmem:[%s987_s3 + $0x78] sm:$0x1]  ;;  %v413_v52 = vld [vmem:[%s987_s3 + $0x60] sm:$0x1]  ;;  %v414_v53 = vld [vmem:[%s987_s3 + $0x68] sm:$0x1] }
  0x13   :  { %587 = vmatmul.msk.f32.gmra.mxu2 %vm41_vm1, %v773_v29  ;;  %590 = vmatmul.msk.f32.gmra.mxu3 %vm41_vm1, %v773_v29  ;;  %v411_v54 = vld [vmem:[%s987_s3 + $0x50] sm:$0xff]  ;;  %v412_v55 = vld [vmem:[%s987_s3 + $0x58] sm:$0xff]  ;;  %v409_v56 = vld [vmem:[%s987_s3 + $0x40] sm:$0xff] }
  0x14   :  { %242 = vmatpush.msrb.mxu2 %v155_v30  ;;  %265 = vmatpush.msrb.mxu3 %v156_v31  ;;  %v410_v57 = vld [vmem:[%s987_s3 + $0x48] sm:$0xff]  ;;  %v407_v58 = vld [vmem:[%s987_s3 + $0x30] sm:$0xff]  ;;  %v408_v59 = vld [vmem:[%s987_s3 + $0x38] sm:$0xff] }
  0x15   :  { %196 = vmatpush.msrb.mxu0 %v153_v32  ;;  %219 = vmatpush.msrb.mxu1 %v154_v33  ;;  %v405_v60 = vld [vmem:[%s987_s3 + $0x20] sm:$0xff]  ;;  %v406_v61 = vld [vmem:[%s987_s3 + $0x28] sm:$0xff]  ;;  %v403_v62 = vld [vmem:[%s987_s3 + $0x10] sm:$0xff] }
  0x16   :  { %609 = vmatpush.msk.msra.mxu2 %vm48_vm0, %v295_v34  ;;  %612 = vmatpush.msk.msra.mxu3 %vm48_vm0, %v296_v35  ;;  %v404_v63 = vld [vmem:[%s987_s3 + $0x18] sm:$0xff]  ;;  %v401_v0 = vld [vmem:[%s987_s3] sm:$0xff]  ;;  %v402_v1 = vld [vmem:[%s987_s3 + $0x8] sm:$0xff] }
  0x17   :  { %603 = vmatpush.msk.msra.mxu0 %vm48_vm0, %v293_v36  ;;  %606 = vmatpush.msk.msra.mxu1 %vm48_vm0, %v294_v37  ;;  %v537_v2 = vld [vmem:[%s988_s5] sm:$0xff]  ;;  %v538_v4 = vld [vmem:[%s988_s5 + $0x8] sm:$0x3] }
  0x18   :  { %368 = vmatpush.msra.mxu2 %v291_v38  ;;  %391 = vmatpush.msra.mxu3 %v292_v39 }
  0x19   :  { %322 = vmatpush.msra.mxu0 %v289_v40  ;;  %345 = vmatpush.msra.mxu1 %v290_v41 }
  0x1a   :  { %592 = vmatmul.msk.f32.vlgmr.msrb.gmra.mxu0 %vm41_vm1, %v720_v16  ;;  %595 = vmatmul.msk.f32.vlgmr.msrb.gmra.mxu1 %vm41_vm1, %v720_v16 }
  0x1b   :  { %598 = vmatmul.msk.f32.vlgmr.msrb.gmra.mxu2 %vm41_vm1, %v720_v16  ;;  %601 = vmatmul.msk.f32.vlgmr.msrb.gmra.mxu3 %vm41_vm1, %v720_v16 }
  0x1c   :  { %369 = vmatpush.msra.mxu2 %v287_v42  ;;  %392 = vmatpush.msra.mxu3 %v288_v43 }
  0x1d   :  { %323 = vmatpush.msra.mxu0 %v285_v44  ;;  %346 = vmatpush.msra.mxu1 %v286_v45 }
  0x1e   :  { %370 = vmatpush.msra.mxu2 %v283_v46  ;;  %393 = vmatpush.msra.mxu3 %v284_v47 }
  0x1f   :  { %324 = vmatpush.msra.mxu0 %v281_v48  ;;  %347 = vmatpush.msra.mxu1 %v282_v49 }
  0x20   :  { %621 = vmatpush.msk.msrb.mxu2 %vm48_vm0, %v415_v50  ;;  %624 = vmatpush.msk.msrb.mxu3 %vm48_vm0, %v416_v51 }
  0x21   :  { %615 = vmatpush.msk.msrb.mxu0 %vm48_vm0, %v413_v52  ;;  %618 = vmatpush.msk.msrb.mxu1 %vm48_vm0, %v414_v53 }
  0x22   :  { %593 = vmatmul.msk.f32.gmra.mxu0 %vm41_vm1, %v773_v29  ;;  %596 = vmatmul.msk.f32.gmra.mxu1 %vm41_vm1, %v773_v29 }
  0x23   :  { %599 = vmatmul.msk.f32.gmra.mxu2 %vm41_vm1, %v773_v29  ;;  %602 = vmatmul.msk.f32.gmra.mxu3 %vm41_vm1, %v773_v29 }
  0x24   :  { %488 = vmatpush.msrb.mxu2 %v411_v54  ;;  %511 = vmatpush.msrb.mxu3 %v412_v55 }
  0x25   :  { %442 = vmatpush.msrb.mxu0 %v409_v56  ;;  %465 = vmatpush.msrb.mxu1 %v410_v57 }
  0x26   :  { %489 = vmatpush.msrb.mxu2 %v407_v58  ;;  %512 = vmatpush.msrb.mxu3 %v408_v59 }
  0x27   :  { %443 = vmatpush.msrb.mxu0 %v405_v60  ;;  %466 = vmatpush.msrb.mxu1 %v406_v61 }
  0x28   :  { %490 = vmatpush.msrb.mxu2 %v403_v62  ;;  %513 = vmatpush.msrb.mxu3 %v404_v63 }
  0x29   :  { %444 = vmatpush.msrb.mxu0 %v401_v0  ;;  %467 = vmatpush.msrb.mxu1 %v402_v1 }
  0x2a   :  { %604 = vmatmul.msk.f32.vlgmr.msra.gmra.mxu0 %vm41_vm1, %v720_v16  ;;  %607 = vmatmul.msk.f32.vlgmr.msra.gmra.mxu1 %vm41_vm1, %v720_v16 }
  0x2b   :  { %610 = vmatmul.msk.f32.vlgmr.msra.gmra.mxu2 %vm41_vm1, %v720_v16  ;;  %613 = vmatmul.msk.f32.vlgmr.msra.gmra.mxu3 %vm41_vm1, %v720_v16 }
  0x2c   :  { %628 = vset.pattern.permute.xlu0 %v629_v3 }
  0x2d   :  { %541 = vperm.xlu0 %628, %v537_v2  }
  0x32   :  { %605 = vmatmul.msk.f32.gmra.mxu0 %vm41_vm1, %v773_v29  ;;  %608 = vmatmul.msk.f32.gmra.mxu1 %vm41_vm1, %v773_v29 }
  0x33   :  { %611 = vmatmul.msk.f32.gmra.mxu2 %vm41_vm1, %v773_v29  ;;  %614 = vmatmul.msk.f32.gmra.mxu3 %vm41_vm1, %v773_v29 }
  0x35   :  { %546 = vperm.xlu0 %628, %v538_v4  }
  0x3a   :  { %616 = vmatmul.msk.f32.vlgmr.msrb.gmra.mxu0 %vm41_vm1, %v720_v16  ;;  %619 = vmatmul.msk.f32.vlgmr.msrb.gmra.mxu1 %vm41_vm1, %v720_v16 }
  0x3b   :  { %622 = vmatmul.msk.f32.vlgmr.msrb.gmra.mxu2 %vm41_vm1, %v720_v16  ;;  %625 = vmatmul.msk.f32.vlgmr.msrb.gmra.mxu3 %vm41_vm1, %v720_v16 }
  0x42   :  { %617 = vmatmul.msk.f32.gmra.mxu0 %vm41_vm1, %v773_v29  ;;  %620 = vmatmul.msk.f32.gmra.mxu1 %vm41_vm1, %v773_v29 }
  0x43   :  { %623 = vmatmul.msk.f32.gmra.mxu2 %vm41_vm1, %v773_v29  ;;  %626 = vmatmul.msk.f32.gmra.mxu3 %vm41_vm1, %v773_v29 }
  0x87   :  { %v78_v5 = vpop.f32.mrf.mxu0  ;;  %v101_v6 = vpop.f32.mrf.mxu1 }
  0x8e   :  { %v124_v7 = vpop.f32.mrf.mxu2  ;;  %v147_v8 = vpop.f32.mrf.mxu3 }
  0x8f   :  { %v81_v9 = vpop.f32.mrf.mxu0  ;;  %v104_v10 = vpop.f32.mrf.mxu1 }
  0x96   :  { %v953_v11 = vpop.f32.mrf.mxu2  ;;  %v955_v12 = vpop.f32.mrf.mxu3 }
  0x97   :  { %v198_v13 = vpop.f32.mrf.mxu0  ;;  %v221_v14 = vpop.f32.mrf.mxu1 }
  0x98   :  { %v273_v31 = vmax.f32 %v78_v5, %v198_v13  ;;  %v274_v32 = vmax.f32 %v101_v6, %v221_v14 }
  0x9e   :  { %v244_v15 = vpop.f32.mrf.mxu2  ;;  %v267_v16 = vpop.f32.mrf.mxu3 }
  0x9f   :  { %v201_v17 = vpop.f32.mrf.mxu0  ;;  %v224_v18 = vpop.f32.mrf.mxu1  ;;  %v275_v44 = vmax.f32 %v124_v7, %v244_v15  ;;  %v276_v45 = vmax.f32 %v147_v8, %v267_v16 }
  0xa0   :  { %v542_v35 = vpop.permute.xlu0 %541  ;;  %v277_v50 = vmax.f32 %v81_v9, %v201_v17  ;;  %v278_v51 = vmax.f32 %v104_v10, %v224_v18 }
  0xa6   :  { %v247_v19 = vpop.f32.mrf.mxu2  ;;  %v270_v20 = vpop.f32.mrf.mxu3 }
  0xa7   :  { %v326_v21 = vpop.f32.mrf.mxu0  ;;  %v349_v22 = vpop.f32.mrf.mxu1  ;;  %v279_v5 = vmax.f32 %v953_v11, %v247_v19  ;;  %v280_v6 = vmax.f32 %v955_v12, %v270_v20 }
  0xa8   :  { %v547_v60 = vpop.permute.xlu0 %546 }
  0xae   :  { %v372_v23 = vpop.f32.mrf.mxu2  ;;  %v395_v24 = vpop.f32.mrf.mxu3 }
  0xaf   :  { %v329_v25 = vpop.f32.mrf.mxu0  ;;  %v352_v26 = vpop.f32.mrf.mxu1 }
  0xb6   :  { %v375_v27 = vpop.f32.mrf.mxu2  ;;  %v398_v28 = vpop.f32.mrf.mxu3 }
  0xb7   :  { %v446_v29 = vpop.f32.mrf.mxu0  ;;  %v469_v30 = vpop.f32.mrf.mxu1 }
  0xb8   :  { %v521_v33 = vmax.f32 %v326_v21, %v446_v29  ;;  %v522_v34 = vmax.f32 %v349_v22, %v469_v30 }
  0xba   :  { %v529_v36 = vmax.f32 %v273_v31, %v521_v33  ;;  %v530_v37 = vmax.f32 %v274_v32, %v522_v34 }
  0xbc   :  { %v549_v38 = vadd.f32 %v542_v35, %v529_v36  ;;  %v550_v39 = vadd.f32 %v542_v35, %v530_v37 }
  0xbe   :  { %v557_v40 = vmax.f32 %v549_v38, 0.0  ;;  %v558_v41 = vmax.f32 %v550_v39, 0.0  ;;  %v492_v42 = vpop.f32.mrf.mxu2  ;;  %v515_v43 = vpop.f32.mrf.mxu3 }
  0xbf   :  { %v523_v46 = vmax.f32 %v372_v23, %v492_v42  ;;  %v524_v47 = vmax.f32 %v395_v24, %v515_v43  ;;  %v449_v48 = vpop.f32.mrf.mxu0  ;;  %v472_v49 = vpop.f32.mrf.mxu1 }
  0xc0   :  { %565 = vst [vmem:[%s989_s6] sm:$0xff] %v557_v40  ;;  %v525_v52 = vmax.f32 %v329_v25, %v449_v48  ;;  %v526_v53 = vmax.f32 %v352_v26, %v472_v49 }
  0xc1   :  { %566 = vst [vmem:[%s989_s6 + $0x8] sm:$0xff] %v558_v41  ;;  %v531_v54 = vmax.f32 %v275_v44, %v523_v46  ;;  %v532_v55 = vmax.f32 %v276_v45, %v524_v47 }
  0xc2   :  { %v533_v56 = vmax.f32 %v277_v50, %v525_v52  ;;  %v534_v57 = vmax.f32 %v278_v51, %v526_v53 }
  0xc3   :  { %v551_v58 = vadd.f32 %v542_v35, %v531_v54  ;;  %v552_v59 = vadd.f32 %v542_v35, %v532_v55 }
  0xc4   :  { %v553_v61 = vadd.f32 %v547_v60, %v533_v56  ;;  %v554_v62 = vadd.f32 %v547_v60, %v534_v57 }
  0xc5   :  { %v559_v63 = vmax.f32 %v551_v58, 0.0  ;;  %v560_v0 = vmax.f32 %v552_v59, 0.0 }
  0xc6   :  { %v561_v1 = vmax.f32 %v553_v61, 0.0  ;;  %v562_v2 = vmax.f32 %v554_v62, 0.0  ;;  %v495_v3 = vpop.f32.mrf.mxu2  ;;  %v518_v4 = vpop.f32.mrf.mxu3 }
  0xc7   :  { %567 = vst [vmem:[%s989_s6 + $0x10] sm:$0xff] %v559_v63  ;;  %v527_v7 = vmax.f32 %v375_v27, %v495_v3  ;;  %v528_v8 = vmax.f32 %v398_v28, %v518_v4 }
  0xc8   :  { %569 = vst.msk [vmem:[%s989_s6 + $0x18] sm:$0xff] %vm568_vm2, %v560_v0 }
  0xc9   :  { %570 = vst [vmem:[%s989_s6 + $0x20] sm:$0x3] %v561_v1  ;;  %v535_v9 = vmax.f32 %v279_v5, %v527_v7  ;;  %v536_v10 = vmax.f32 %v280_v6, %v528_v8 }
  0xca   :  { %571 = vst [vmem:[%s989_s6 + $0x28] sm:$0x3] %v562_v2 }
  0xcb   :  { %v555_v11 = vadd.f32 %v547_v60, %v535_v9  ;;  %v556_v12 = vadd.f32 %v547_v60, %v536_v10 }
  0xcd   :  { %v563_v13 = vmax.f32 %v555_v11, 0.0  ;;  %v564_v14 = vmax.f32 %v556_v12, 0.0 }
  0xcf   :  { %572 = vst [vmem:[%s989_s6 + $0x30] sm:$0x3] %v563_v13 }
  0xd0   :  { %574 = vst.msk [vmem:[%s989_s6 + $0x38] sm:$0x3] %vm573_vm3, %v564_v14 }

// kernel: lenet_forward.4
= control target key start
LH: loop header
LB: loop body
LE: loop exit
PB: predicated region body
PF: predicated region fallthrough
CT: control target
= control target key end

     0   :  { %vm91_vm0 = vcmask 1041408   ;;  %vm69_vm1 = vcmask 998400   ;;  %vm543_vm2 = vcmask 162816   ;;  %vm550_vm3 = vcmask 156672   ;;  %s1187_s4 = inlined_call_operand.vmem [shape: f32[250,20], index: 4, kind: input, shape index: {}]   ;;  %s1188_s1 = inlined_call_operand.vmem [shape: f32[50,250], index: 1, kind: input, shape index: {}]   ;;  %s1189_s0 = inlined_call_operand.vmem [shape: f32[50,250], index: 0, kind: input, shape index: {}]   ;;  %s1190_s3 = inlined_call_operand.vmem [shape: f32[50,250], index: 3, kind: input, shape index: {}]   ;;  %s1191_s2 = inlined_call_operand.vmem [shape: f32[50,250], index: 2, kind: input, shape index: {}]   ;;  %s1192_s5 = inlined_call_operand.vmem [shape: f32[1,20], index: 5, kind: input, shape index: {}]   ;;  %s1193_s6 = inlined_call_operand.vmem [shape: f32[50,20], index: 6, kind: output, shape index: {}]  }
   0x1   :  { %v627_v0 = vld [vmem:[%s1187_s4 + $0x78] sm:$0xff]  ;;  %v637_v2 = vld [vmem:[%s1187_s4 + $0x70] sm:$0xff]  ;;  %v650_v4 = vld [vmem:[%s1187_s4 + $0x68] sm:$0xff] }
   0x2   :  { %v632_v1 = vld [vmem:[%s1187_s4 + $0xf8] sm:$0x3]  ;;  %206 = vmatpush.msra.mxu2 %v627_v0  ;;  %v645_v3 = vld [vmem:[%s1187_s4 + $0xf0] sm:$0xff]  ;;  %v655_v5 = vld [vmem:[%s1187_s4 + $0xe8] sm:$0xff]  ;;  %95 = vmatpush.msra.mxu0 %v627_v0 }
   0x3   :  { %564 = vmatpush.msk.msra.mxu3 %vm91_vm0, %v632_v1  ;;  %556 = vmatpush.msk.msra.mxu1 %vm91_vm0, %v632_v1  ;;  %v665_v6 = vld [vmem:[%s1187_s4 + $0x60] sm:$0xff]  ;;  %v679_v8 = vld [vmem:[%s1187_s4 + $0x58] sm:$0xff]  ;;  %v693_v10 = vld [vmem:[%s1187_s4 + $0x50] sm:$0xff] }
   0x4   :  { %207 = vmatpush.msra.mxu2 %v637_v2  ;;  %v670_v7 = vld [vmem:[%s1187_s4 + $0xe0] sm:$0xff]  ;;  %96 = vmatpush.msra.mxu0 %v637_v2  ;;  %v684_v9 = vld [vmem:[%s1187_s4 + $0xd8] sm:$0xff]  ;;  %v698_v11 = vld [vmem:[%s1187_s4 + $0xd0] sm:$0xff] }
   0x5   :  { %245 = vmatpush.msra.mxu3 %v645_v3  ;;  %134 = vmatpush.msra.mxu1 %v645_v3  ;;  %v707_v12 = vld [vmem:[%s1187_s4 + $0x48] sm:$0xff]  ;;  %v721_v14 = vld [vmem:[%s1187_s4 + $0x40] sm:$0xff]  ;;  %v735_v16 = vld [vmem:[%s1187_s4 + $0x38] sm:$0xff] }
   0x6   :  { %208 = vmatpush.msra.mxu2 %v650_v4  ;;  %97 = vmatpush.msra.mxu0 %v650_v4  ;;  %v712_v13 = vld [vmem:[%s1187_s4 + $0xc8] sm:$0xff]  ;;  %v726_v15 = vld [vmem:[%s1187_s4 + $0xc0] sm:$0xff]  ;;  %v740_v17 = vld [vmem:[%s1187_s4 + $0xb8] sm:$0xff] }
   0x7   :  { %246 = vmatpush.msra.mxu3 %v655_v5  ;;  %135 = vmatpush.msra.mxu1 %v655_v5  ;;  %v749_v18 = vld [vmem:[%s1187_s4 + $0x30] sm:$0xff]  ;;  %v763_v20 = vld [vmem:[%s1187_s4 + $0x28] sm:$0xff]  ;;  %v777_v22 = vld [vmem:[%s1187_s4 + $0x20] sm:$0xff] }
   0x8   :  { %209 = vmatpush.msra.mxu2 %v665_v6  ;;  %98 = vmatpush.msra.mxu0 %v665_v6  ;;  %v754_v19 = vld [vmem:[%s1187_s4 + $0xb0] sm:$0xff]  ;;  %v768_v21 = vld [vmem:[%s1187_s4 + $0xa8] sm:$0xff]  ;;  %v782_v23 = vld [vmem:[%s1187_s4 + $0xa0] sm:$0xff] }
   0x9   :  { %247 = vmatpush.msra.mxu3 %v670_v7  ;;  %136 = vmatpush.msra.mxu1 %v670_v7  ;;  %v791_v24 = vld [vmem:[%s1187_s4 + $0x18] sm:$0xff]  ;;  %v805_v26 = vld [vmem:[%s1187_s4 + $0x10] sm:$0xff]  ;;  %v819_v28 = vld [vmem:[%s1187_s4 + $0x8] sm:$0xff] }
   0xa   :  { %210 = vmatpush.msra.mxu2 %v679_v8  ;;  %99 = vmatpush.msra.mxu0 %v679_v8  ;;  %v796_v25 = vld [vmem:[%s1187_s4 + $0x98] sm:$0xff]  ;;  %v810_v27 = vld [vmem:[%s1187_s4 + $0x90] sm:$0xff]  ;;  %v824_v29 = vld [vmem:[%s1187_s4 + $0x88] sm:$0xff] }
   0xb   :  { %248 = vmatpush.msra.mxu3 %v684_v9  ;;  %137 = vmatpush.msra.mxu1 %v684_v9  ;;  %v833_v30 = vld [vmem:[%s1187_s4] sm:$0xff]  ;;  %v172_v33 = vld [vmem:[%s1188_s1 + $0x8] sm:$0xff]  ;;  %v173_v36 = vld [vmem:[%s1188_s1 + $0x10] sm:$0xff] }
   0xc   :  { %211 = vmatpush.msra.mxu2 %v693_v10  ;;  %100 = vmatpush.msra.mxu0 %v693_v10  ;;  %v838_v31 = vld [vmem:[%s1187_s4 + $0x80] sm:$0xff]  ;;  %v56_v35 = vld [vmem:[%s1189_s0 + $0x8] sm:$0xff]  ;;  %v174_v37 = vld [vmem:[%s1188_s1 + $0x18] sm:$0xff] }
   0xd   :  { %249 = vmatpush.msra.mxu3 %v698_v11  ;;  %138 = vmatpush.msra.mxu1 %v698_v11  ;;  %v171_v32 = vld [vmem:[%s1188_s1] sm:$0xff]  ;;  %v57_v38 = vld [vmem:[%s1189_s0 + $0x10] sm:$0xff]  ;;  %v58_v39 = vld [vmem:[%s1189_s0 + $0x18] sm:$0xff] }
   0xe   :  { %212 = vmatpush.msra.mxu2 %v707_v12  ;;  %101 = vmatpush.msra.mxu0 %v707_v12  ;;  %v55_v34 = vld [vmem:[%s1189_s0] sm:$0xff]  ;;  %v176_v41 = vld [vmem:[%s1188_s1 + $0x28] sm:$0xff]  ;;  %v177_v44 = vld [vmem:[%s1188_s1 + $0x30] sm:$0xff] }
   0xf   :  { %250 = vmatpush.msra.mxu3 %v712_v13  ;;  %139 = vmatpush.msra.mxu1 %v712_v13  ;;  %v175_v40 = vld [vmem:[%s1188_s1 + $0x20] sm:$0xff]  ;;  %v60_v43 = vld [vmem:[%s1189_s0 + $0x28] sm:$0xff]  ;;  %v178_v45 = vld [vmem:[%s1188_s1 + $0x38] sm:$0xff] }
  0x10   :  { %213 = vmatpush.msra.mxu2 %v721_v14  ;;  %102 = vmatpush.msra.mxu0 %v721_v14  ;;  %v59_v42 = vld [vmem:[%s1189_s0 + $0x20] sm:$0xff]  ;;  %v61_v46 = vld [vmem:[%s1189_s0 + $0x30] sm:$0xff]  ;;  %v62_v47 = vld [vmem:[%s1189_s0 + $0x38] sm:$0xff] }
  0x11   :  { %251 = vmatpush.msra.mxu3 %v726_v15  ;;  %140 = vmatpush.msra.mxu1 %v726_v15  ;;  %v179_v48 = vld [vmem:[%s1188_s1 + $0x40] sm:$0xff]  ;;  %v180_v49 = vld [vmem:[%s1188_s1 + $0x48] sm:$0xff]  ;;  %v181_v52 = vld [vmem:[%s1188_s1 + $0x50] sm:$0xff] }
  0x12   :  { %214 = vmatpush.msra.mxu2 %v735_v16  ;;  %103 = vmatpush.msra.mxu0 %v735_v16  ;;  %v63_v50 = vld [vmem:[%s1189_s0 + $0x40] sm:$0xff]  ;;  %v64_v51 = vld [vmem:[%s1189_s0 + $0x48] sm:$0xff]  ;;  %v182_v53 = vld [vmem:[%s1188_s1 + $0x58] sm:$0xff] }
  0x13   :  { %252 = vmatpush.msra.mxu3 %v740_v17  ;;  %141 = vmatpush.msra.mxu1 %v740_v17  ;;  %v65_v54 = vld [vmem:[%s1189_s0 + $0x50] sm:$0xff]  ;;  %v66_v55 = vld [vmem:[%s1189_s0 + $0x58] sm:$0xff]  ;;  %v183_v56 = vld [vmem:[%s1188_s1 + $0x60] sm:$0x3] }
  0x14   :  { %215 = vmatpush.msra.mxu2 %v749_v18  ;;  %104 = vmatpush.msra.mxu0 %v749_v18  ;;  %v184_v57 = vld [vmem:[%s1188_s1 + $0x68] sm:$0x3]  ;;  %v67_v58 = vld [vmem:[%s1189_s0 + $0x60] sm:$0x3] }
  0x15   :  { %253 = vmatpush.msra.mxu3 %v754_v19  ;;  %142 = vmatpush.msra.mxu1 %v754_v19  ;;  %v68_v59 = vld [vmem:[%s1189_s0 + $0x68] sm:$0x3]  ;;  %v400_v60 = vld [vmem:[%s1190_s3] sm:$0xff] }
  0x16   :  { %216 = vmatpush.msra.mxu2 %v763_v20  ;;  %105 = vmatpush.msra.mxu0 %v763_v20  ;;  %v401_v61 = vld [vmem:[%s1190_s3 + $0x8] sm:$0xff]  ;;  %v289_v62 = vld [vmem:[%s1191_s2] sm:$0xff] }
  0x17   :  { %254 = vmatpush.msra.mxu3 %v768_v21  ;;  %143 = vmatpush.msra.mxu1 %v768_v21  ;;  %v290_v63 = vld [vmem:[%s1191_s2 + $0x8] sm:$0xff] }
  0x18   :  { %217 = vmatpush.msra.mxu2 %v777_v22  ;;  %106 = vmatpush.msra.mxu0 %v777_v22 }
  0x19   :  { %255 = vmatpush.msra.mxu3 %v782_v23  ;;  %144 = vmatpush.msra.mxu1 %v782_v23 }
  0x1a   :  { %218 = vmatpush.msra.mxu2 %v791_v24  ;;  %107 = vmatpush.msra.mxu0 %v791_v24 }
  0x1b   :  { %256 = vmatpush.msra.mxu3 %v796_v25  ;;  %145 = vmatpush.msra.mxu1 %v796_v25 }
  0x1c   :  { %219 = vmatpush.msra.mxu2 %v805_v26  ;;  %108 = vmatpush.msra.mxu0 %v805_v26 }
  0x1d   :  { %257 = vmatpush.msra.mxu3 %v810_v27  ;;  %146 = vmatpush.msra.mxu1 %v810_v27 }
  0x1e   :  { %220 = vmatpush.msra.mxu2 %v819_v28  ;;  %109 = vmatpush.msra.mxu0 %v819_v28 }
  0x1f   :  { %258 = vmatpush.msra.mxu3 %v824_v29  ;;  %147 = vmatpush.msra.mxu1 %v824_v29 }
  0x20   :  { %221 = vmatpush.msra.mxu2 %v833_v30  ;;  %110 = vmatpush.msra.mxu0 %v833_v30 }
  0x21   :  { %259 = vmatpush.msra.mxu3 %v838_v31  ;;  %222 = vmatmul.f32.vlgmr.msra.gmra.mxu2 %v171_v32 }
  0x22   :  { %565 = vmatmul.msk.f32.vlgmr.msra.gmra.mxu3 %vm69_vm1, %v172_v33  ;;  %435 = vmatpush.msrb.mxu2 %v627_v0 }
  0x23   :  { %580 = vmatpush.msk.msrb.mxu3 %vm91_vm0, %v632_v1  ;;  %148 = vmatpush.msra.mxu1 %v838_v31 }
  0x24   :  { %436 = vmatpush.msrb.mxu2 %v637_v2  ;;  %111 = vmatmul.f32.vlgmr.msra.gmra.mxu0 %v55_v34 }
  0x25   :  { %474 = vmatpush.msrb.mxu3 %v645_v3  ;;  %557 = vmatmul.msk.f32.vlgmr.msra.gmra.mxu1 %vm69_vm1, %v56_v35 }
  0x26   :  { %324 = vmatpush.msrb.mxu0 %v627_v0  ;;  %572 = vmatpush.msk.msrb.mxu1 %vm91_vm0, %v632_v1  ;;  %v402_v0 = vld [vmem:[%s1190_s3 + $0x10] sm:$0xff]  ;;  %v403_v1 = vld [vmem:[%s1190_s3 + $0x18] sm:$0xff] }
  0x27   :  { %437 = vmatpush.msrb.mxu2 %v650_v4  ;;  %475 = vmatpush.msrb.mxu3 %v655_v5 }
  0x28   :  { %325 = vmatpush.msrb.mxu0 %v637_v2  ;;  %363 = vmatpush.msrb.mxu1 %v645_v3  ;;  %v291_v2 = vld [vmem:[%s1191_s2 + $0x10] sm:$0xff]  ;;  %v292_v3 = vld [vmem:[%s1191_s2 + $0x18] sm:$0xff] }
  0x29   :  { %225 = vmatmul.f32.gmra.mxu2 %v173_v36  ;;  %476 = vmatpush.msrb.mxu3 %v670_v7 }
  0x2a   :  { %566 = vmatmul.msk.f32.gmra.mxu3 %vm69_vm1, %v174_v37  ;;  %438 = vmatpush.msrb.mxu2 %v665_v6 }
  0x2b   :  { %326 = vmatpush.msrb.mxu0 %v650_v4  ;;  %364 = vmatpush.msrb.mxu1 %v655_v5  ;;  %v404_v4 = vld [vmem:[%s1190_s3 + $0x20] sm:$0xff]  ;;  %v405_v5 = vld [vmem:[%s1190_s3 + $0x28] sm:$0xff] }
  0x2c   :  { %439 = vmatpush.msrb.mxu2 %v679_v8  ;;  %477 = vmatpush.msrb.mxu3 %v684_v9 }
  0x2d   :  { %114 = vmatmul.f32.gmra.mxu0 %v57_v38  ;;  %558 = vmatmul.msk.f32.gmra.mxu1 %vm69_vm1, %v58_v39 }
  0x2e   :  { %327 = vmatpush.msrb.mxu0 %v665_v6  ;;  %365 = vmatpush.msrb.mxu1 %v670_v7  ;;  %v293_v6 = vld [vmem:[%s1191_s2 + $0x20] sm:$0xff]  ;;  %v294_v7 = vld [vmem:[%s1191_s2 + $0x28] sm:$0xff] }
  0x2f   :  { %440 = vmatpush.msrb.mxu2 %v693_v10  ;;  %478 = vmatpush.msrb.mxu3 %v698_v11 }
  0x30   :  { %328 = vmatpush.msrb.mxu0 %v679_v8  ;;  %366 = vmatpush.msrb.mxu1 %v684_v9  ;;  %v406_v8 = vld [vmem:[%s1190_s3 + $0x30] sm:$0xff]  ;;  %v407_v9 = vld [vmem:[%s1190_s3 + $0x38] sm:$0xff] }
  0x31   :  { %228 = vmatmul.f32.gmra.mxu2 %v175_v40  ;;  %479 = vmatpush.msrb.mxu3 %v712_v13 }
  0x32   :  { %567 = vmatmul.msk.f32.gmra.mxu3 %vm69_vm1, %v176_v41  ;;  %441 = vmatpush.msrb.mxu2 %v707_v12 }
  0x33   :  { %329 = vmatpush.msrb.mxu0 %v693_v10  ;;  %367 = vmatpush.msrb.mxu1 %v698_v11  ;;  %v295_v10 = vld [vmem:[%s1191_s2 + $0x30] sm:$0xff]  ;;  %v296_v11 = vld [vmem:[%s1191_s2 + $0x38] sm:$0xff] }
  0x34   :  { %442 = vmatpush.msrb.mxu2 %v721_v14  ;;  %480 = vmatpush.msrb.mxu3 %v726_v15 }
  0x35   :  { %117 = vmatmul.f32.gmra.mxu0 %v59_v42  ;;  %559 = vmatmul.msk.f32.gmra.mxu1 %vm69_vm1, %v60_v43 }
  0x36   :  { %330 = vmatpush.msrb.mxu0 %v707_v12  ;;  %368 = vmatpush.msrb.mxu1 %v712_v13  ;;  %v408_v12 = vld [vmem:[%s1190_s3 + $0x40] sm:$0xff]  ;;  %v409_v13 = vld [vmem:[%s1190_s3 + $0x48] sm:$0xff] }
  0x37   :  { %443 = vmatpush.msrb.mxu2 %v735_v16  ;;  %481 = vmatpush.msrb.mxu3 %v740_v17 }
  0x38   :  { %331 = vmatpush.msrb.mxu0 %v721_v14  ;;  %369 = vmatpush.msrb.mxu1 %v726_v15  ;;  %v297_v14 = vld [vmem:[%s1191_s2 + $0x40] sm:$0xff]  ;;  %v298_v15 = vld [vmem:[%s1191_s2 + $0x48] sm:$0xff] }
  0x39   :  { %231 = vmatmul.f32.gmra.mxu2 %v177_v44  ;;  %482 = vmatpush.msrb.mxu3 %v754_v19 }
  0x3a   :  { %568 = vmatmul.msk.f32.gmra.mxu3 %vm69_vm1, %v178_v45  ;;  %444 = vmatpush.msrb.mxu2 %v749_v18 }
  0x3b   :  { %332 = vmatpush.msrb.mxu0 %v735_v16  ;;  %370 = vmatpush.msrb.mxu1 %v740_v17  ;;  %v410_v16 = vld [vmem:[%s1190_s3 + $0x50] sm:$0xff]  ;;  %v411_v17 = vld [vmem:[%s1190_s3 + $0x58] sm:$0xff] }
  0x3c   :  { %445 = vmatpush.msrb.mxu2 %v763_v20  ;;  %483 = vmatpush.msrb.mxu3 %v768_v21 }
  0x3d   :  { %120 = vmatmul.f32.gmra.mxu0 %v61_v46  ;;  %560 = vmatmul.msk.f32.gmra.mxu1 %vm69_vm1, %v62_v47 }
  0x3e   :  { %333 = vmatpush.msrb.mxu0 %v749_v18  ;;  %371 = vmatpush.msrb.mxu1 %v754_v19  ;;  %v299_v18 = vld [vmem:[%s1191_s2 + $0x50] sm:$0xff]  ;;  %v300_v19 = vld [vmem:[%s1191_s2 + $0x58] sm:$0xff] }
  0x3f   :  { %446 = vmatpush.msrb.mxu2 %v777_v22  ;;  %484 = vmatpush.msrb.mxu3 %v782_v23 }
  0x40   :  { %334 = vmatpush.msrb.mxu0 %v763_v20  ;;  %372 = vmatpush.msrb.mxu1 %v768_v21  ;;  %v412_v20 = vld [vmem:[%s1190_s3 + $0x60] sm:$0x3]  ;;  %v413_v21 = vld [vmem:[%s1190_s3 + $0x68] sm:$0x3] }
  0x41   :  { %234 = vmatmul.f32.gmra.mxu2 %v179_v48  ;;  %485 = vmatpush.msrb.mxu3 %v796_v25 }
  0x42   :  { %569 = vmatmul.msk.f32.gmra.mxu3 %vm69_vm1, %v180_v49  ;;  %447 = vmatpush.msrb.mxu2 %v791_v24 }
  0x43   :  { %335 = vmatpush.msrb.mxu0 %v777_v22  ;;  %373 = vmatpush.msrb.mxu1 %v782_v23  ;;  %v301_v22 = vld [vmem:[%s1191_s2 + $0x60] sm:$0x3]  ;;  %v302_v23 = vld [vmem:[%s1191_s2 + $0x68] sm:$0x3] }
  0x44   :  { %448 = vmatpush.msrb.mxu2 %v805_v26  ;;  %486 = vmatpush.msrb.mxu3 %v810_v27 }
  0x45   :  { %123 = vmatmul.f32.gmra.mxu0 %v63_v50  ;;  %561 = vmatmul.msk.f32.gmra.mxu1 %vm69_vm1, %v64_v51 }
  0x46   :  { %336 = vmatpush.msrb.mxu0 %v791_v24  ;;  %374 = vmatpush.msrb.mxu1 %v796_v25 }
  0x47   :  { %449 = vmatpush.msrb.mxu2 %v819_v28  ;;  %487 = vmatpush.msrb.mxu3 %v824_v29 }
  0x48   :  { %337 = vmatpush.msrb.mxu0 %v805_v26  ;;  %375 = vmatpush.msrb.mxu1 %v810_v27 }
  0x49   :  { %237 = vmatmul.f32.gmra.mxu2 %v181_v52  ;;  %488 = vmatpush.msrb.mxu3 %v838_v31 }
  0x4a   :  { %570 = vmatmul.msk.f32.gmra.mxu3 %vm69_vm1, %v182_v53  ;;  %450 = vmatpush.msrb.mxu2 %v833_v30 }
  0x4b   :  { %338 = vmatpush.msrb.mxu0 %v819_v28  ;;  %376 = vmatpush.msrb.mxu1 %v824_v29 }
  0x4d   :  { %126 = vmatmul.f32.gmra.mxu0 %v65_v54  ;;  %562 = vmatmul.msk.f32.gmra.mxu1 %vm69_vm1, %v66_v55 }
  0x4e   :  { %339 = vmatpush.msrb.mxu0 %v833_v30  ;;  %377 = vmatpush.msrb.mxu1 %v838_v31 }
  0x51   :  { %240 = vmatmul.f32.gmra.mxu2 %v183_v56 }
  0x52   :  { %571 = vmatmul.msk.f32.gmra.mxu3 %vm69_vm1, %v184_v57 }
  0x55   :  { %129 = vmatmul.f32.gmra.mxu0 %v67_v58  ;;  %563 = vmatmul.msk.f32.gmra.mxu1 %vm69_vm1, %v68_v59 }
  0x59   :  { %451 = vmatmul.f32.vlgmr.msrb.gmra.mxu2 %v400_v60 }
  0x5a   :  { %581 = vmatmul.msk.f32.vlgmr.msrb.gmra.mxu3 %vm69_vm1, %v401_v61 }
  0x5d   :  { %340 = vmatmul.f32.vlgmr.msrb.gmra.mxu0 %v289_v62  ;;  %573 = vmatmul.msk.f32.vlgmr.msrb.gmra.mxu1 %vm69_vm1, %v290_v63  ;;  %v1139_v62 = vld [vmem:[%s1192_s5] ss:$0 sm:$0xff] }
  0x61   :  { %454 = vmatmul.f32.gmra.mxu2 %v402_v0 }
  0x62   :  { %582 = vmatmul.msk.f32.gmra.mxu3 %vm69_vm1, %v403_v1 }
  0x65   :  { %343 = vmatmul.f32.gmra.mxu0 %v291_v2  ;;  %574 = vmatmul.msk.f32.gmra.mxu1 %vm69_vm1, %v292_v3 }
  0x69   :  { %457 = vmatmul.f32.gmra.mxu2 %v404_v4 }
  0x6a   :  { %583 = vmatmul.msk.f32.gmra.mxu3 %vm69_vm1, %v405_v5 }
  0x6d   :  { %346 = vmatmul.f32.gmra.mxu0 %v293_v6  ;;  %575 = vmatmul.msk.f32.gmra.mxu1 %vm69_vm1, %v294_v7 }
  0x71   :  { %460 = vmatmul.f32.gmra.mxu2 %v406_v8 }
  0x72   :  { %584 = vmatmul.msk.f32.gmra.mxu3 %vm69_vm1, %v407_v9 }
  0x75   :  { %349 = vmatmul.f32.gmra.mxu0 %v295_v10  ;;  %576 = vmatmul.msk.f32.gmra.mxu1 %vm69_vm1, %v296_v11 }
  0x79   :  { %463 = vmatmul.f32.gmra.mxu2 %v408_v12 }
  0x7a   :  { %585 = vmatmul.msk.f32.gmra.mxu3 %vm69_vm1, %v409_v13 }
  0x7d   :  { %352 = vmatmul.f32.gmra.mxu0 %v297_v14  ;;  %577 = vmatmul.msk.f32.gmra.mxu1 %vm69_vm1, %v298_v15 }
  0x81   :  { %466 = vmatmul.f32.gmra.mxu2 %v410_v16 }
  0x82   :  { %586 = vmatmul.msk.f32.gmra.mxu3 %vm69_vm1, %v411_v17 }
  0x85   :  { %355 = vmatmul.f32.gmra.mxu0 %v299_v18  ;;  %578 = vmatmul.msk.f32.gmra.mxu1 %vm69_vm1, %v300_v19 }
  0x89   :  { %469 = vmatmul.f32.gmra.mxu2 %v412_v20 }
  0x8a   :  { %587 = vmatmul.msk.f32.gmra.mxu3 %vm69_vm1, %v413_v21 }
  0x8d   :  { %358 = vmatmul.f32.gmra.mxu0 %v301_v22  ;;  %579 = vmatmul.msk.f32.gmra.mxu1 %vm69_vm1, %v302_v23 }
  0xa1   :  { %v112_v24 = vpop.f32.mrf.mxu0 }
  0xa2   :  { %v150_v25 = vpop.f32.mrf.mxu1 }
  0xa3   :  { %v151_v54 = vadd.f32 %v150_v25, %v112_v24 }
  0xa4   :  { %v223_v26 = vpop.f32.mrf.mxu2 }
  0xa5   :  { %v261_v27 = vpop.f32.mrf.mxu3 }
  0xa6   :  { %v262_v55 = vadd.f32 %v261_v27, %v223_v26 }
  0xa8   :  { %v282_v60 = vmax.f32 %v151_v54, %v262_v55 }
  0xaa   :  { %v115_v28 = vpop.f32.mrf.mxu0  ;;  %v153_v29 = vpop.f32.mrf.mxu1 }
  0xab   :  { %v154_v2 = vadd.f32 %v153_v29, %v115_v28 }
  0xac   :  { %v226_v30 = vpop.f32.mrf.mxu2 }
  0xad   :  { %v264_v31 = vpop.f32.mrf.mxu3 }
  0xae   :  { %v265_v3 = vadd.f32 %v264_v31, %v226_v30 }
  0xb0   :  { %v283_v10 = vmax.f32 %v154_v2, %v265_v3 }
  0xb2   :  { %v118_v32 = vpop.f32.mrf.mxu0  ;;  %v156_v33 = vpop.f32.mrf.mxu1 }
  0xb3   :  { %v157_v15 = vadd.f32 %v156_v33, %v118_v32 }
  0xb4   :  { %v229_v34 = vpop.f32.mrf.mxu2 }
  0xb5   :  { %v267_v35 = vpop.f32.mrf.mxu3 }
  0xb6   :  { %v268_v16 = vadd.f32 %v267_v35, %v229_v34 }
  0xb8   :  { %v284_v23 = vmax.f32 %v157_v15, %v268_v16 }
  0xba   :  { %v121_v36 = vpop.f32.mrf.mxu0  ;;  %v159_v37 = vpop.f32.mrf.mxu1 }
  0xbb   :  { %v160_v28 = vadd.f32 %v159_v37, %v121_v36 }
  0xbc   :  { %v232_v38 = vpop.f32.mrf.mxu2 }
  0xbd   :  { %v270_v39 = vpop.f32.mrf.mxu3 }
  0xbe   :  { %v271_v29 = vadd.f32 %v270_v39, %v232_v38 }
  0xc2   :  { %v1112_v40 = vpop.f32.mrf.mxu0  ;;  %v1114_v41 = vpop.f32.mrf.mxu1 }
  0xc3   :  { %v163_v36 = vadd.f32 %v1114_v41, %v1112_v40 }
  0xc4   :  { %v1116_v42 = vpop.f32.mrf.mxu2 }
  0xc5   :  { %v1118_v43 = vpop.f32.mrf.mxu3 }
  0xc6   :  { %v274_v37 = vadd.f32 %v1118_v43, %v1116_v42 }
  0xca   :  { %v1120_v44 = vpop.f32.mrf.mxu0  ;;  %v1122_v45 = vpop.f32.mrf.mxu1 }
  0xcb   :  { %v166_v41 = vadd.f32 %v1122_v45, %v1120_v44 }
  0xcc   :  { %v1124_v46 = vpop.f32.mrf.mxu2 }
  0xcd   :  { %v1126_v47 = vpop.f32.mrf.mxu3 }
  0xce   :  { %v277_v42 = vadd.f32 %v1126_v47, %v1124_v46 }
  0xd2   :  { %v1128_v48 = vpop.f32.mrf.mxu0  ;;  %v1130_v49 = vpop.f32.mrf.mxu1 }
  0xd3   :  { %v169_v45 = vadd.f32 %v1130_v49, %v1128_v48 }
  0xd4   :  { %v1132_v50 = vpop.f32.mrf.mxu2 }
  0xd5   :  { %v1134_v51 = vpop.f32.mrf.mxu3 }
  0xd6   :  { %v280_v46 = vadd.f32 %v1134_v51, %v1132_v50 }
  0xd8   :  { %v288_v16 = vmax.f32 %v169_v45, %v280_v46 }
  0xda   :  { %v341_v52 = vpop.f32.mrf.mxu0  ;;  %v379_v53 = vpop.f32.mrf.mxu1 }
  0xdb   :  { %v380_v56 = vadd.f32 %v379_v53, %v341_v52  ;;  %v285_v52 = vmax.f32 %v160_v28, %v271_v29 }
  0xdc   :  { %v452_v57 = vpop.f32.mrf.mxu2 }
  0xdd   :  { %v490_v58 = vpop.f32.mrf.mxu3 }
  0xde   :  { %v491_v59 = vadd.f32 %v490_v58, %v452_v57 }
  0xe0   :  { %v511_v61 = vmax.f32 %v380_v56, %v491_v59 }
  0xe2   :  { %v518_v63 = vmax.f32 %v282_v60, %v511_v61  ;;  %v344_v0 = vpop.f32.mrf.mxu0  ;;  %v382_v1 = vpop.f32.mrf.mxu1  ;;  %v286_v61 = vmax.f32 %v163_v36, %v274_v37 }
  0xe3   :  { %v383_v5 = vadd.f32 %v382_v1, %v344_v0 }
  0xe4   :  { %v529_v4 = vadd.f32 %v1139_v62, %v518_v63  ;;  %v455_v6 = vpop.f32.mrf.mxu2 }
  0xe5   :  { %v493_v7 = vpop.f32.mrf.mxu3 }
  0xe6   :  { %v536_v8 = vmax.f32 %v529_v4, 0.0  ;;  %v494_v9 = vadd.f32 %v493_v7, %v455_v6  ;;  %v287_v7 = vmax.f32 %v166_v41, %v277_v42 }
  0xe8   :  { %544 = vst.msk [vmem:[%s1193_s6] sm:$0xff] %vm543_vm2, %v536_v8  ;;  %v512_v11 = vmax.f32 %v383_v5, %v494_v9 }
  0xea   :  { %v519_v12 = vmax.f32 %v283_v10, %v512_v11  ;;  %v347_v13 = vpop.f32.mrf.mxu0  ;;  %v385_v14 = vpop.f32.mrf.mxu1 }
  0xeb   :  { %v386_v18 = vadd.f32 %v385_v14, %v347_v13 }
  0xec   :  { %v530_v17 = vadd.f32 %v1139_v62, %v519_v12  ;;  %v458_v19 = vpop.f32.mrf.mxu2 }
  0xed   :  { %v496_v20 = vpop.f32.mrf.mxu3 }
  0xee   :  { %v537_v21 = vmax.f32 %v530_v17, 0.0  ;;  %v497_v22 = vadd.f32 %v496_v20, %v458_v19 }
  0xf0   :  { %545 = vst.msk [vmem:[%s1193_s6 + $0x8] sm:$0xff] %vm543_vm2, %v537_v21  ;;  %v513_v24 = vmax.f32 %v386_v18, %v497_v22 }
  0xf2   :  { %v520_v25 = vmax.f32 %v284_v23, %v513_v24  ;;  %v350_v26 = vpop.f32.mrf.mxu0  ;;  %v388_v27 = vpop.f32.mrf.mxu1 }
  0xf3   :  { %v389_v31 = vadd.f32 %v388_v27, %v350_v26 }
  0xf4   :  { %v531_v30 = vadd.f32 %v1139_v62, %v520_v25  ;;  %v461_v32 = vpop.f32.mrf.mxu2 }
  0xf5   :  { %v499_v33 = vpop.f32.mrf.mxu3 }
  0xf6   :  { %v538_v34 = vmax.f32 %v531_v30, 0.0  ;;  %v500_v35 = vadd.f32 %v499_v33, %v461_v32 }
  0xf8   :  { %546 = vst.msk [vmem:[%s1193_s6 + $0x10] sm:$0xff] %vm543_vm2, %v538_v34  ;;  %v514_v53 = vmax.f32 %v389_v31, %v500_v35 }
  0xfa   :  { %v521_v54 = vmax.f32 %v285_v52, %v514_v53  ;;  %v353_v55 = vpop.f32.mrf.mxu0  ;;  %v391_v56 = vpop.f32.mrf.mxu1 }
  0xfb   :  { %v392_v39 = vadd.f32 %v391_v56, %v353_v55 }
  0xfc   :  { %v532_v38 = vadd.f32 %v1139_v62, %v521_v54  ;;  %v464_v57 = vpop.f32.mrf.mxu2 }
  0xfd   :  { %v502_v58 = vpop.f32.mrf.mxu3 }
  0xfe   :  { %v539_v59 = vmax.f32 %v532_v38, 0.0  ;;  %v503_v60 = vadd.f32 %v502_v58, %v464_v57 }
 0x100   :  { %547 = vst.msk [vmem:[%s1193_s6 + $0x18] sm:$0xff] %vm543_vm2, %v539_v59  ;;  %v515_v63 = vmax.f32 %v392_v39, %v503_v60 }
 0x102   :  { %v522_v0 = vmax.f32 %v286_v61, %v515_v63  ;;  %v356_v1 = vpop.f32.mrf.mxu0  ;;  %v394_v40 = vpop.f32.mrf.mxu1 }
 0x103   :  { %v395_v2 = vadd.f32 %v394_v40, %v356_v1 }
 0x104   :  { %v533_v43 = vadd.f32 %v1139_v62, %v522_v0  ;;  %v467_v3 = vpop.f32.mrf.mxu2 }
 0x105   :  { %v505_v4 = vpop.f32.mrf.mxu3 }
 0x106   :  { %v540_v5 = vmax.f32 %v533_v43, 0.0  ;;  %v506_v6 = vadd.f32 %v505_v4, %v467_v3 }
 0x108   :  { %548 = vst.msk [vmem:[%s1193_s6 + $0x20] sm:$0xff] %vm543_vm2, %v540_v5  ;;  %v516_v8 = vmax.f32 %v395_v2, %v506_v6 }
 0x10a   :  { %v523_v9 = vmax.f32 %v287_v7, %v516_v8  ;;  %v359_v10 = vpop.f32.mrf.mxu0  ;;  %v397_v44 = vpop.f32.mrf.mxu1 }
 0x10b   :  { %v398_v11 = vadd.f32 %v397_v44, %v359_v10 }
 0x10c   :  { %v534_v47 = vadd.f32 %v1139_v62, %v523_v9  ;;  %v470_v12 = vpop.f32.mrf.mxu2 }
 0x10d   :  { %v508_v13 = vpop.f32.mrf.mxu3 }
 0x10e   :  { %v541_v14 = vmax.f32 %v534_v47, 0.0  ;;  %v509_v15 = vadd.f32 %v508_v13, %v470_v12 }
 0x110   :  { %549 = vst.msk [vmem:[%s1193_s6 + $0x28] sm:$0xff] %vm543_vm2, %v541_v14  ;;  %v517_v17 = vmax.f32 %v398_v11, %v509_v15 }
 0x112   :  { %v524_v18 = vmax.f32 %v288_v16, %v517_v17 }
 0x114   :  { %v535_v48 = vadd.f32 %v1139_v62, %v524_v18 }
 0x116   :  { %v542_v49 = vmax.f32 %v535_v48, 0.0 }
 0x118   :  { %551 = vst.msk [vmem:[%s1193_s6 + $0x30] sm:$0x3] %vm550_vm3, %v542_v49 }

// kernel: lenet_forward.5
= control target key start
LH: loop header
LB: loop body
LE: loop exit
PB: predicated region body
PF: predicated region fallthrough
CT: control target
= control target key end

     0   :  { %vm101_vm0 = vcmask 1043456   ;;  %s548_s0 = inlined_call_operand.vmem [shape: f32[2,500], index: 0, kind: input, shape index: {}]   ;;  %s549_s1 = inlined_call_operand.vmem [shape: f32[500,50], index: 1, kind: input, shape index: {}]   ;;  %s550_s2 = inlined_call_operand.vmem [shape: f32[1,50], index: 2, kind: input, shape index: {}]   ;;  %s551_s3 = inlined_call_operand.vmem [shape: f32[50,10], index: 3, kind: input, shape index: {}]   ;;  %s552_s4 = inlined_call_operand.vmem [shape: f32[1,10], index: 4, kind: input, shape index: {}]   ;;  %s553_s5 = inlined_call_operand.hbm [shape: f32[2,10], index: 5, kind: output, shape index: {}]  }
   0x1   :  { %v69_v0 = vld [vmem:[%s549_s1 + $0x178] sm:$0xff]  ;;  %v68_v2 = vld [vmem:[%s549_s1 + $0x170] sm:$0xff]  ;;  %v67_v5 = vld [vmem:[%s549_s1 + $0x168] sm:$0xff] }
   0x2   :  { %v37_v1 = vld [vmem:[%s549_s1 + $0x78] sm:$0xff]  ;;  %145 = vmatpush.msra.mxu2 %v69_v0  ;;  %v36_v3 = vld [vmem:[%s549_s1 + $0x70] sm:$0xff]  ;;  %v35_v7 = vld [vmem:[%s549_s1 + $0x68] sm:$0xff] }
   0x3   :  { %105 = vmatpush.msra.mxu0 %v37_v1  ;;  %v53_v4 = vld [vmem:[%s549_s1 + $0xf8] sm:$0xff]  ;;  %v84_v6 = vld [vmem:[%s549_s1 + $0x1f0] sm:$0xf]  ;;  %v83_v9 = vld [vmem:[%s549_s1 + $0x1e8] sm:$0xff] }
   0x4   :  { %125 = vmatpush.msra.mxu1 %v53_v4  ;;  %v52_v8 = vld [vmem:[%s549_s1 + $0xf0] sm:$0xff]  ;;  %146 = vmatpush.msra.mxu2 %v68_v2  ;;  %v66_v10 = vld [vmem:[%s549_s1 + $0x160] sm:$0xff]  ;;  %v51_v12 = vld [vmem:[%s549_s1 + $0xe8] sm:$0xff] }
   0x5   :  { %106 = vmatpush.msra.mxu0 %v36_v3  ;;  %255 = vmatpush.msk.msra.mxu3 %vm101_vm0, %v84_v6  ;;  %v34_v11 = vld [vmem:[%s549_s1 + $0x60] sm:$0xff]  ;;  %v65_v15 = vld [vmem:[%s549_s1 + $0x158] sm:$0xff]  ;;  %v64_v19 = vld [vmem:[%s549_s1 + $0x150] sm:$0xff] }
   0x6   :  { %126 = vmatpush.msra.mxu1 %v52_v8  ;;  %147 = vmatpush.msra.mxu2 %v67_v5  ;;  %v82_v13 = vld [vmem:[%s549_s1 + $0x1e0] sm:$0xff]  ;;  %v33_v16 = vld [vmem:[%s549_s1 + $0x58] sm:$0xff]  ;;  %v32_v20 = vld [vmem:[%s549_s1 + $0x50] sm:$0xff] }
   0x7   :  { %107 = vmatpush.msra.mxu0 %v35_v7  ;;  %v50_v14 = vld [vmem:[%s549_s1 + $0xe0] sm:$0xff]  ;;  %167 = vmatpush.msra.mxu3 %v83_v9  ;;  %v81_v17 = vld [vmem:[%s549_s1 + $0x1d8] sm:$0xff]  ;;  %v80_v21 = vld [vmem:[%s549_s1 + $0x1d0] sm:$0xff] }
   0x8   :  { %127 = vmatpush.msra.mxu1 %v51_v12  ;;  %148 = vmatpush.msra.mxu2 %v66_v10  ;;  %v49_v18 = vld [vmem:[%s549_s1 + $0xd8] sm:$0xff]  ;;  %v48_v22 = vld [vmem:[%s549_s1 + $0xd0] sm:$0xff]  ;;  %v63_v23 = vld [vmem:[%s549_s1 + $0x148] sm:$0xff] }
   0x9   :  { %108 = vmatpush.msra.mxu0 %v34_v11  ;;  %168 = vmatpush.msra.mxu3 %v82_v13  ;;  %v31_v24 = vld [vmem:[%s549_s1 + $0x48] sm:$0xff]  ;;  %v62_v27 = vld [vmem:[%s549_s1 + $0x140] sm:$0xff]  ;;  %v61_v31 = vld [vmem:[%s549_s1 + $0x138] sm:$0xff] }
   0xa   :  { %128 = vmatpush.msra.mxu1 %v50_v14  ;;  %149 = vmatpush.msra.mxu2 %v65_v15  ;;  %v79_v25 = vld [vmem:[%s549_s1 + $0x1c8] sm:$0xff]  ;;  %v30_v28 = vld [vmem:[%s549_s1 + $0x40] sm:$0xff]  ;;  %v29_v32 = vld [vmem:[%s549_s1 + $0x38] sm:$0xff] }
   0xb   :  { %109 = vmatpush.msra.mxu0 %v33_v16  ;;  %169 = vmatpush.msra.mxu3 %v81_v17  ;;  %v47_v26 = vld [vmem:[%s549_s1 + $0xc8] sm:$0xff]  ;;  %v78_v29 = vld [vmem:[%s549_s1 + $0x1c0] sm:$0xff]  ;;  %v77_v33 = vld [vmem:[%s549_s1 + $0x1b8] sm:$0xff] }
   0xc   :  { %129 = vmatpush.msra.mxu1 %v49_v18  ;;  %150 = vmatpush.msra.mxu2 %v64_v19  ;;  %v46_v30 = vld [vmem:[%s549_s1 + $0xc0] sm:$0xff]  ;;  %v45_v34 = vld [vmem:[%s549_s1 + $0xb8] sm:$0xff]  ;;  %v60_v35 = vld [vmem:[%s549_s1 + $0x130] sm:$0xff] }
   0xd   :  { %110 = vmatpush.msra.mxu0 %v32_v20  ;;  %170 = vmatpush.msra.mxu3 %v80_v21  ;;  %v28_v36 = vld [vmem:[%s549_s1 + $0x30] sm:$0xff]  ;;  %v59_v39 = vld [vmem:[%s549_s1 + $0x128] sm:$0xff]  ;;  %v21_v43 = vld [vmem:[%s548_s0] sm:$0xff] }
   0xe   :  { %130 = vmatpush.msra.mxu1 %v48_v22  ;;  %151 = vmatpush.msra.mxu2 %v63_v23  ;;  %v76_v37 = vld [vmem:[%s549_s1 + $0x1b0] sm:$0xff]  ;;  %v27_v40 = vld [vmem:[%s549_s1 + $0x28] sm:$0xff]  ;;  %v58_v44 = vld [vmem:[%s549_s1 + $0x120] sm:$0xff]  ;;  %90 = vst [vmem:[#allocation1] ss:$4 sm:$0xff] %v21_v43 }
   0xf   :  { %111 = vmatpush.msra.mxu0 %v31_v24  ;;  %171 = vmatpush.msra.mxu3 %v79_v25  ;;  %v44_v38 = vld [vmem:[%s549_s1 + $0xb0] sm:$0xff]  ;;  %v75_v41 = vld [vmem:[%s549_s1 + $0x1a8] sm:$0xff]  ;;  %v26_v45 = vld [vmem:[%s549_s1 + $0x20] sm:$0xff] }
  0x10   :  { %131 = vmatpush.msra.mxu1 %v47_v26  ;;  %152 = vmatpush.msra.mxu2 %v62_v27  ;;  %v43_v42 = vld [vmem:[%s549_s1 + $0xa8] sm:$0xff]  ;;  %v57_v46 = vld [vmem:[%s549_s1 + $0x118] sm:$0xff]  ;;  %v74_v47 = vld [vmem:[%s549_s1 + $0x1a0] sm:$0xff] }
  0x11   :  { %112 = vmatpush.msra.mxu0 %v30_v28  ;;  %172 = vmatpush.msra.mxu3 %v78_v29  ;;  %v42_v48 = vld [vmem:[%s549_s1 + $0xa0] sm:$0xff]  ;;  %v25_v49 = vld [vmem:[%s549_s1 + $0x18] sm:$0xff] }
  0x12   :  { %132 = vmatpush.msra.mxu1 %v46_v30  ;;  %153 = vmatpush.msra.mxu2 %v61_v31 }
  0x13   :  { %113 = vmatpush.msra.mxu0 %v29_v32  ;;  %173 = vmatpush.msra.mxu3 %v77_v33 }
  0x14   :  { %133 = vmatpush.msra.mxu1 %v45_v34  ;;  %154 = vmatpush.msra.mxu2 %v60_v35 }
  0x15   :  { %114 = vmatpush.msra.mxu0 %v28_v36  ;;  %174 = vmatpush.msra.mxu3 %v76_v37 }
  0x16   :  { %134 = vmatpush.msra.mxu1 %v44_v38  ;;  %155 = vmatpush.msra.mxu2 %v59_v39 }
  0x17   :  { %115 = vmatpush.msra.mxu0 %v27_v40  ;;  %175 = vmatpush.msra.mxu3 %v75_v41 }
  0x18   :  { %135 = vmatpush.msra.mxu1 %v43_v42 }
  0x19   :  { %10 = vsyncpa [#allocation3], 0  ;;  %156 = vmatpush.msra.mxu2 %v58_v44  ;;  %116 = vmatpush.msra.mxu0 %v26_v45  ;;  %v73_v50 = vld [vmem:[%s549_s1 + $0x198] sm:$0xff]  ;;  %v56_v52 = vld [vmem:[%s549_s1 + $0x110] sm:$0xff]  ;;  %vm98_vm1 = vcmask 949248   ;;  %vm201_vm2 = vcmask 1041408  }
  0x1a   :  { %v41_v51 = vld [vmem:[%s549_s1 + $0x98] sm:$0xff]  ;;  %176 = vmatpush.msra.mxu3 %v74_v47  ;;  %136 = vmatpush.msra.mxu1 %v42_v48  ;;  %v24_v53 = vld [vmem:[%s549_s1 + $0x10] sm:$0xff]  ;;  %v55_v56 = vld [vmem:[%s549_s1 + $0x108] sm:$0xff]  ;;  %vm197_vm3 = vcmask 408576   ;;  %vm225_vm4 = vcmask 74752   ;;  %s246_s12 = sshll.u32 %s553_s5, 4  ;;  %s247_s12 = int_to_ptr.hbm [resolvable:$true] %s246_s12 }
  0x1b   :  { %157 = vmatpush.msra.mxu2 %v57_v46  ;;  %117 = vmatpush.msra.mxu0 %v25_v49  ;;  %v72_v54 = vld [vmem:[%s549_s1 + $0x190] sm:$0xff]  ;;  %v23_v57 = vld [vmem:[%s549_s1 + $0x8] sm:$0xff]  ;;  %v54_v60 = vld [vmem:[%s549_s1 + $0x100] sm:$0xff] }
  0x1c   :  { %v40_v55 = vld [vmem:[%s549_s1 + $0x90] sm:$0xff]  ;;  %177 = vmatpush.msra.mxu3 %v73_v50  ;;  %137 = vmatpush.msra.mxu1 %v41_v51  ;;  %v71_v58 = vld [vmem:[%s549_s1 + $0x188] sm:$0xff]  ;;  %v22_v61 = vld [vmem:[%s549_s1] sm:$0xff] }
  0x1d   :  { %158 = vmatpush.msra.mxu2 %v56_v52  ;;  %118 = vmatpush.msra.mxu0 %v24_v53  ;;  %v39_v59 = vld [vmem:[%s549_s1 + $0x88] sm:$0xff]  ;;  %v93_v62 = vld.sshfl [vmem:[#allocation1 + $0x10] sm:$0xff pattern:$0x73625140]  ;;  %v70_v63 = vld [vmem:[%s549_s1 + $0x180] sm:$0xff] }
  0x1e   :  { %178 = vmatpush.msra.mxu3 %v72_v54  ;;  %138 = vmatpush.msra.mxu1 %v40_v55  ;;  %v91_v0 = vld.sshfl [vmem:[#allocation1] sm:$0xff pattern:$0x73625140]  ;;  %v94_v1 = vld.sshfl [vmem:[#allocation1 + $0x18] sm:$0xff pattern:$0x73625140] }
  0x1f   :  { %159 = vmatpush.msra.mxu2 %v55_v56  ;;  %119 = vmatpush.msra.mxu0 %v23_v57  ;;  %v38_v2 = vld [vmem:[%s549_s1 + $0x80] sm:$0xff]  ;;  %v192_v3 = vld [vmem:[%s551_s3 + $0x30] sm:$0x3]  ;;  %v92_v4 = vld.sshfl [vmem:[#allocation1 + $0x8] sm:$0xff pattern:$0x73625140] }
  0x20   :  { %179 = vmatpush.msra.mxu3 %v71_v58  ;;  %139 = vmatpush.msra.mxu1 %v39_v59  ;;  %v191_v5 = vld [vmem:[%s551_s3 + $0x28] sm:$0xff]  ;;  %v190_v6 = vld [vmem:[%s551_s3 + $0x20] sm:$0xff]  ;;  %v189_v7 = vld [vmem:[%s551_s3 + $0x18] sm:$0xff] }
  0x21   :  { %160 = vmatpush.msra.mxu2 %v54_v60  ;;  %120 = vmatpush.msra.mxu0 %v22_v61  ;;  %v188_v8 = vld [vmem:[%s551_s3 + $0x10] sm:$0xff]  ;;  %v187_v9 = vld [vmem:[%s551_s3 + $0x8] sm:$0xff]  ;;  %v186_v10 = vld [vmem:[%s551_s3] sm:$0xff] }
  0x22   :  { %161 = vmatmul.f32.vlgmr.msra.gmra.mxu2 %v93_v62  ;;  %180 = vmatpush.msra.mxu3 %v70_v63  ;;  %v260_v11 = vld [vmem:[%s550_s2] ss:$0 sm:$0xff]  ;;  %s292_s2 = smov [#allocation2]  }
  0x23   :  { %121 = vmatmul.f32.vlgmr.msra.gmra.mxu0 %v91_v0  ;;  %256 = vmatmul.msk.f32.vlgmr.msra.gmra.mxu3 %vm98_vm1, %v94_v1  ;;  %v261_v21 = vld [vmem:[%s552_s4] ss:$0 sm:$0xff]  ;;  %s244_s3 = sshll.u32 %s292_s2, 4  ;;  %s245_s3 = int_to_ptr.vmem [resolvable:$true] %s244_s3 }
  0x24   :  { %140 = vmatpush.msra.mxu1 %v38_v2  ;;  %257 = vmatpush.msk.msrb.mxu3 %vm201_vm2, %v192_v3 }
  0x25   :  { %141 = vmatmul.f32.vlgmr.msra.gmra.mxu1 %v92_v4 }
  0x26   :  { %215 = vmatpush.msrb.mxu3 %v191_v5 }
  0x28   :  { %216 = vmatpush.msrb.mxu3 %v190_v6 }
  0x2a   :  { %217 = vmatpush.msrb.mxu3 %v189_v7 }
  0x2c   :  { %218 = vmatpush.msrb.mxu3 %v188_v8 }
  0x2e   :  { %219 = vmatpush.msrb.mxu3 %v187_v9 }
  0x30   :  { %220 = vmatpush.msrb.mxu3 %v186_v10 }
  0xa0   :  { %v122_v12 = vpop.f32.mrf.mxu0 }
  0xa1   :  { %v123_v13 = vadd.f32 %v260_v11, %v122_v12 }
  0xa2   :  { %v142_v14 = vpop.f32.mrf.mxu1 }
  0xa3   :  { %v143_v15 = vadd.f32 %v142_v14, %v123_v13 }
  0xa5   :  { %v162_v16 = vpop.f32.mrf.mxu2 }
  0xa6   :  { %v163_v17 = vadd.f32 %v162_v16, %v143_v15  ;;  %v182_v18 = vpop.f32.mrf.mxu3 }
  0xa8   :  { %v183_v19 = vadd.f32 %v182_v18, %v163_v17 }
  0xaa   :  { %v185_v20 = vmax.f32 %v183_v19, 0.0 }
  0xac   :  { %258 = vmatmul.msk.f32.vlgmr.msrb.gmra.mxu3 %vm197_vm3, %v185_v20 }
 0x12f   :  { %v222_v22 = vpop.f32.mrf.mxu3 }
 0x130   :  { %v223_v23 = vadd.f32 %v261_v21, %v222_v22 }
 0x132   :  { %v226_v24 = vsel %vm225_vm4, %v223_v23, -inf }
 0x133   :  { %227 = vmax.xlane.f32.xlu0 %v226_v24 }
 0x1a6   :  { %v228_v25 = vpop.xlane.xlu0 %227 }
 0x1a7   :  { %v229_v26 = vsub.f32 %v223_v23, %v228_v25 }
 0x1a9   :  { %v230_v27 = vmul.f32 1.442695, %v229_v26 }
 0x1ab   :  { %262 = vpow2.f32 %v230_v27 }
 0x1b1   :  { %v263_v28 = vpop.eup %262 }
 0x1b2   :  { %v232_v29 = vsel %vm225_vm4, %v263_v28, 0.0 }
 0x1b3   :  { %233 = vadd.xlane.f32.xlu0 %v232_v29 }
 0x226   :  { %v234_v30 = vpop.xlane.xlu0 %233 }
 0x227   :  { %264 = vlog2.f32 %v234_v30 }
 0x22d   :  { %v265_v31 = vpop.eup %264 }
 0x22e   :  { %v236_v32 = vmul.f32 0.6931472, %v265_v31 }
 0x230   :  { %v237_v33 = vsub.f32 %v229_v26, %v236_v32 }
 0x232   :  { %238 = vst.msk [vmem:[#allocation2] sm:$0x3] %vm225_vm4, %v237_v33 }
 0x233   :  { %249 = dma.vmem_to_hbm [thread:$0]  %s245_s3, 32, %s247_s12, [#allocation3]  }
 0x234   :  { %290 = dma.done.wait [#allocation3], 32  }
 0x235   :  { %291 = vsyncadd [#allocation3], 4294967264 }
 0x236   :  { %254 = vsyncpa [#allocation3], 1 }

</bundles_post_ra>
